<compile_context>
chip_gen: v7x
topology: tpu7x:2x2x1
jax: 0.10.0
libtpu: 0.0.40
codegen_flags: <defaults>
</compile_context>

<pallas_src>
import jax
import jax.numpy as jnp
from jax.experimental import pallas as pl
from jax.experimental.pallas import tpu as pltpu

# PyTorch gate order is (i, f, g, o); the kernel uses (i, f, o, g) so the three
# plain-sigmoid gates are contiguous in the fused lane axis.
GATE_PERM = (0, 1, 3, 2)


def lstm_kernel(x_ref, wx_ref, wh_hbm, b_ref, wlin_ref, blin_ref, out_ref,
                wh_vmem, xp_ref, dma_sem):
    S = x_ref.shape[0]            # seq_len (static)
    Hp = wh_vmem.shape[0]         # padded hidden dim (128)

    # Start the Wh HBM->VMEM DMA and hide it behind the hoisted input projection.
    wh_cp = pltpu.make_async_copy(wh_hbm, wh_vmem, dma_sem)
    wh_cp.start()

    # Hoisted input projection + bias: one (S, D_pad) x (D_pad, 4*Hp) bf16 matmul with
    # f32 accumulation, staged in VMEM scratch so per-step reads are cheap vlds.
    xp_ref[...] = (jnp.dot(x_ref[...].astype(jnp.bfloat16), wx_ref[...],
                           preferred_element_type=jnp.float32)
                   + b_ref[...])                          # (S, 4*Hp) f32

    wh_cp.wait()

    h = jnp.zeros((1, Hp), jnp.float32)
    c = jnp.zeros((1, Hp), jnp.float32)

    # Statically unrolled recurrence: one fused bf16 (1,Hp)x(Hp,4*Hp) matmul per step,
    # one homogeneous sigmoid over the full preactivation (tanh expressed as
    # 2*sigmoid(2x)-1 with the 2x folded into the g-gate weights), and one sigmoid
    # for tanh(c).
    for t in range(S):
        pre = xp_ref[t:t + 1, :] + jnp.dot(
            h.astype(jnp.bfloat16), wh_vmem[...],
            preferred_element_type=jnp.float32)           # (1, 4*Hp) f32
        sig = jax.nn.sigmoid(pre)                         # single EUP sweep, all gates
        i = sig[:, 0 * Hp:1 * Hp]
        f = sig[:, 1 * Hp:2 * Hp]
        o = sig[:, 2 * Hp:3 * Hp]
        g = 2.0 * sig[:, 3 * Hp:4 * Hp] - 1.0             # == tanh(pre_g), VPU fixup
        c = f * c + i * g
        h = o * (2.0 * jax.nn.sigmoid(2.0 * c) - 1.0)     # == o * tanh(c)

    # Final linear (output_dim == 1): VPU multiply + lane reduction instead of an
    # N=1 MXU matmul.  predictions[-1] == linear(h_T).
    out_ref[...] = (jnp.sum(h * wlin_ref[...], axis=-1, keepdims=True)
                    + blin_ref[...])


def lstm_forward(x, packed, *, d_pad=128):
    """x: (seq_len, input_dim) float32. Returns shape (output_dim,) == predictions[-1]."""
    wx, wh, b, wlin, blin = packed
    S, D = x.shape
    Hp, Hp4 = wh.shape
    x_pad = jnp.zeros((S, d_pad), jnp.float32).at[:, :D].set(x)
    out = pl.pallas_call(
        lstm_kernel,
        out_shape=jax.ShapeDtypeStruct((1, 1), jnp.float32),
        in_specs=[
            pl.BlockSpec(memory_space=pltpu.MemorySpace.VMEM),   # x (padded)
            pl.BlockSpec(memory_space=pltpu.MemorySpace.VMEM),   # wx_fused (bf16)
            pl.BlockSpec(memory_space=pl.ANY),                   # wh_fused (manual DMA)
            pl.BlockSpec(memory_space=pltpu.MemorySpace.VMEM),   # b_fused
            pl.BlockSpec(memory_space=pltpu.MemorySpace.VMEM),   # w_lin row
            pl.BlockSpec(memory_space=pltpu.MemorySpace.VMEM),   # b_lin
        ],
        out_specs=pl.BlockSpec(memory_space=pltpu.MemorySpace.VMEM),
        scratch_shapes=[
            pltpu.VMEM((Hp, Hp4), jnp.bfloat16),    # Wh staged in VMEM
            pltpu.VMEM((S, Hp4), jnp.float32),      # hoisted input projection
            pltpu.SemaphoreType.DMA(()),            # Wh DMA completion
        ],
    )(x_pad, wx, wh, b, wlin, blin)
    return out[0]


def init_raw_params(key, input_dim, hidden_dim, output_dim):
    """PyTorch-layout parameters with uniform(-1/sqrt(H), 1/sqrt(H)) init."""
    k = 1.0 / jnp.sqrt(jnp.float32(hidden_dim))
    ks = jax.random.split(key, 6)
    w_ih = jax.random.uniform(ks[0], (4 * hidden_dim, input_dim), jnp.float32, -k, k)
    w_hh = jax.random.uniform(ks[1], (4 * hidden_dim, hidden_dim), jnp.float32, -k, k)
    b_ih = jax.random.uniform(ks[2], (4 * hidden_dim,), jnp.float32, -k, k)
    b_hh = jax.random.uniform(ks[3], (4 * hidden_dim,), jnp.float32, -k, k)
    w_lin = jax.random.uniform(ks[4], (output_dim, hidden_dim), jnp.float32, -k, k)
    b_lin = jax.random.uniform(ks[5], (output_dim,), jnp.float32, -k, k)
    return (w_ih, w_hh, b_ih, b_hh, w_lin, b_lin)


def pack_params(raw, *, d_pad=128, h_pad=128):
    """Repack PyTorch-layout weights into fused, padded, right-matmul, bf16 form."""
    w_ih, w_hh, b_ih, b_hh, w_lin, b_lin = raw
    H = w_hh.shape[1]
    D = w_ih.shape[1]
    perm = jnp.array(GATE_PERM)                           # array indexing (not a list)

    wx_g = w_ih.reshape(4, H, D)[perm]                    # (4, H, D)  order i,f,o,g
    wh_g = w_hh.reshape(4, H, H)[perm]                    # (4, H, H)
    b_g = (b_ih + b_hh).reshape(4, H)[perm]               # (4, H)

    # Fold the 2x of tanh(x) = 2*sigmoid(2x) - 1 into the g-gate preactivation.
    gate_scale = jnp.array([1.0, 1.0, 1.0, 2.0], jnp.float32)
    wx_g = wx_g * gate_scale[:, None, None]
    wh_g = wh_g * gate_scale[:, None, None]
    b_g = b_g * gate_scale[:, None]

    # Transpose for right-matmul, zero-pad to hardware tiles.
    wx_p = jnp.zeros((4, d_pad, h_pad), jnp.float32).at[:, :D, :H].set(
        jnp.transpose(wx_g, (0, 2, 1)))
    wh_p = jnp.zeros((4, h_pad, h_pad), jnp.float32).at[:, :H, :H].set(
        jnp.transpose(wh_g, (0, 2, 1)))
    b_p = jnp.zeros((4, h_pad), jnp.float32).at[:, :H].set(b_g)

    # bf16 weights for the MXU (f32 accumulation in-kernel); biases stay f32.
    wx_fused = jnp.concatenate([wx_p[g] for g in range(4)],
                               axis=1).astype(jnp.bfloat16)        # (d_pad, 4*h_pad)
    wh_fused = jnp.concatenate([wh_p[g] for g in range(4)],
                               axis=1).astype(jnp.bfloat16)        # (h_pad, 4*h_pad)
    b_fused = b_p.reshape(1, 4 * h_pad)                            # (1, 4*h_pad) f32

    # output_dim == 1: store the single linear row, lane-padded, f32 (VPU path).
    wlin_row = jnp.zeros((1, h_pad), jnp.float32).at[0, :H].set(w_lin[0])
    blin = b_lin.reshape(1, 1)
    return (wx_fused, wh_fused, b_fused, wlin_row, blin)


def reference_forward(x, raw):
    """Pure-JAX reference of the PyTorch module's forward (unpadded, PyTorch layout)."""
    w_ih, w_hh, b_ih, b_hh, w_lin, b_lin = raw
    H = w_hh.shape[1]
    h = jnp.zeros((1, H), jnp.float32)
    c = jnp.zeros((1, H), jnp.float32)
    for t in range(x.shape[0]):
        x_t = x[t:t + 1]
        gates = x_t @ w_ih.T + h @ w_hh.T + b_ih + b_hh   # gate order i, f, g, o
        i = jax.nn.sigmoid(gates[:, 0 * H:1 * H])
        f = jax.nn.sigmoid(gates[:, 1 * H:2 * H])
        g = jnp.tanh(gates[:, 2 * H:3 * H])
        o = jax.nn.sigmoid(gates[:, 3 * H:4 * H])
        c = f * c + i * g
        h = o * jnp.tanh(c)
    return (h @ w_lin.T + b_lin)[0]


if __name__ == "__main__":
    INPUT_DIM = 30       # module defaults
    HIDDEN_DIM = 100
    OUTPUT_DIM = 1
    SEQ_LEN = 8

    key = jax.random.PRNGKey(0)
    key_x, key_p = jax.random.split(key)
    x = jax.random.normal(key_x, (SEQ_LEN, INPUT_DIM), jnp.float32)

    raw = init_raw_params(key_p, INPUT_DIM, HIDDEN_DIM, OUTPUT_DIM)
    packed = pack_params(raw)

    out = lstm_forward(x, packed)
    jax.block_until_ready(out)

    ref = reference_forward(x, raw)
    assert out.shape == (OUTPUT_DIM,)
    # bf16 weight quantization over the 8-step recurrence -> ~1e-2-level tolerance.
    assert jnp.allclose(out, ref, atol=2e-2, rtol=2e-2), (out, ref)

    print("KERNEL_OK")
</pallas_src>

<mosaic_0001>
module attributes {stable_mosaic.version = 11 : i64} {
  func.func @lstm_kernel(%arg0: memref<8x128xf32, #tpu.memory_space<vmem>>, %arg1: memref<128x512xbf16, #tpu.memory_space<vmem>>, %arg2: memref<128x512xbf16, #tpu.memory_space<any>>, %arg3: memref<1x512xf32, #tpu.memory_space<vmem>>, %arg4: memref<1x128xf32, #tpu.memory_space<vmem>>, %arg5: memref<1x1xf32, #tpu.memory_space<vmem>>, %arg6: memref<1x1xf32, #tpu.memory_space<vmem>>, %arg7: memref<128x512xbf16, #tpu.memory_space<vmem>>, %arg8: memref<8x512xf32, #tpu.memory_space<vmem>>, %arg9: memref<!tpu.dma_semaphore, #tpu.memory_space<semaphore_mem>>) attributes {dimension_semantics = [], scalar_prefetch = 0 : i64, scratch_operands = 3 : i64, tpu.core_type = #tpu.core_type<tc>} {
    tpu.enqueue_dma source(%arg2 : memref<128x512xbf16, #tpu.memory_space<any>>) target(%arg7 : memref<128x512xbf16, #tpu.memory_space<vmem>>) target_semaphore(%arg9 : memref<!tpu.dma_semaphore, #tpu.memory_space<semaphore_mem>>)
    %c0 = arith.constant 0 : index
    %c0_0 = arith.constant 0 : index
    %0 = vector.load %arg0[%c0, %c0_0] : memref<8x128xf32, #tpu.memory_space<vmem>>, vector<8x128xf32>
    %1 = arith.truncf %0 : vector<8x128xf32> to vector<8x128xbf16>
    %c0_1 = arith.constant 0 : index
    %c0_2 = arith.constant 0 : index
    %2 = vector.load %arg1[%c0_1, %c0_2] : memref<128x512xbf16, #tpu.memory_space<vmem>>, vector<128x512xbf16>
    %cst = arith.constant dense<0.000000e+00> : vector<8x512xf32>
    %3 = tpu.matmul %1, %2, %cst {dimension_numbers = #tpu.dot_dimension_numbers<[1], [0], [0], [1], [0, 0, 1, 1], [], []>} : vector<8x128xbf16>, vector<128x512xbf16>, vector<8x512xf32> -> vector<8x512xf32>
    %c0_3 = arith.constant 0 : index
    %c0_4 = arith.constant 0 : index
    %4 = vector.load %arg3[%c0_3, %c0_4] : memref<1x512xf32, #tpu.memory_space<vmem>>, vector<1x512xf32>
    %5 = vector.broadcast %4 : vector<1x512xf32> to vector<8x512xf32>
    %6 = arith.addf %3, %5 : vector<8x512xf32>
    %c0_5 = arith.constant 0 : index
    %c0_6 = arith.constant 0 : index
    %7 = vector.load %arg8[%c0_5, %c0_6] : memref<8x512xf32, #tpu.memory_space<vmem>>, vector<8x512xf32>
    tpu.vector_store %arg8[%c0_5, %c0_6], %6 {strides = array<i32>} : memref<8x512xf32, #tpu.memory_space<vmem>>, vector<8x512xf32>,
    tpu.wait_dma2 semaphore(%arg9 : memref<!tpu.dma_semaphore, #tpu.memory_space<semaphore_mem>>) src(%arg2 : memref<128x512xbf16, #tpu.memory_space<any>>) dst(%arg7 : memref<128x512xbf16, #tpu.memory_space<vmem>>)
    %cst_7 = arith.constant 0.000000e+00 : f32
    %8 = vector.broadcast %cst_7 : f32 to vector<1x128xf32>
    %cst_8 = arith.constant 0.000000e+00 : f32
    %9 = vector.broadcast %cst_8 : f32 to vector<1x128xf32>
    %c0_9 = arith.constant 0 : index
    %c0_10 = arith.constant 0 : index
    %10 = vector.load %arg8[%c0_9, %c0_10] : memref<8x512xf32, #tpu.memory_space<vmem>>, vector<1x512xf32>
    %11 = arith.truncf %8 : vector<1x128xf32> to vector<1x128xbf16>
    %c0_11 = arith.constant 0 : index
    %c0_12 = arith.constant 0 : index
    %12 = vector.load %arg7[%c0_11, %c0_12] : memref<128x512xbf16, #tpu.memory_space<vmem>>, vector<128x512xbf16>
    %cst_13 = arith.constant dense<0.000000e+00> : vector<1x512xf32>
    %13 = tpu.matmul %11, %12, %cst_13 {dimension_numbers = #tpu.dot_dimension_numbers<[1], [0], [0], [1], [0, 0, 1, 1], [], []>} : vector<1x128xbf16>, vector<128x512xbf16>, vector<1x512xf32> -> vector<1x512xf32>
    %14 = arith.addf %10, %13 : vector<1x512xf32>
    %15 = arith.negf %14 : vector<1x512xf32>
    %16 = math.exp %15 : vector<1x512xf32>
    %cst_14 = arith.constant 1.000000e+00 : f32
    %17 = vector.broadcast %cst_14 : f32 to vector<1x512xf32>
    %18 = arith.addf %17, %16 : vector<1x512xf32>
    %19 = arith.divf %17, %18 : vector<1x512xf32>
    %20 = vector.extract_strided_slice %19 {offsets = [0, 0], sizes = [1, 128], strides = [1, 1]} : vector<1x512xf32> to vector<1x128xf32>
    %21 = vector.extract_strided_slice %19 {offsets = [0, 128], sizes = [1, 128], strides = [1, 1]} : vector<1x512xf32> to vector<1x128xf32>
    %22 = vector.extract_strided_slice %19 {offsets = [0, 256], sizes = [1, 128], strides = [1, 1]} : vector<1x512xf32> to vector<1x128xf32>
    %23 = vector.extract_strided_slice %19 {offsets = [0, 384], sizes = [1, 128], strides = [1, 1]} : vector<1x512xf32> to vector<1x128xf32>
    %cst_15 = arith.constant 2.000000e+00 : f32
    %24 = vector.broadcast %cst_15 : f32 to vector<1x128xf32>
    %25 = arith.mulf %24, %23 : vector<1x128xf32>
    %cst_16 = arith.constant 1.000000e+00 : f32
    %26 = vector.broadcast %cst_16 : f32 to vector<1x128xf32>
    %27 = arith.subf %25, %26 : vector<1x128xf32>
    %28 = arith.mulf %21, %9 : vector<1x128xf32>
    %29 = arith.mulf %20, %27 : vector<1x128xf32>
    %30 = arith.addf %28, %29 : vector<1x128xf32>
    %cst_17 = arith.constant 2.000000e+00 : f32
    %31 = vector.broadcast %cst_17 : f32 to vector<1x128xf32>
    %32 = arith.mulf %31, %30 : vector<1x128xf32>
    %33 = arith.negf %32 : vector<1x128xf32>
    %34 = math.exp %33 : vector<1x128xf32>
    %cst_18 = arith.constant 1.000000e+00 : f32
    %35 = vector.broadcast %cst_18 : f32 to vector<1x128xf32>
    %36 = arith.addf %35, %34 : vector<1x128xf32>
    %37 = arith.divf %35, %36 : vector<1x128xf32>
    %cst_19 = arith.constant 2.000000e+00 : f32
    %38 = vector.broadcast %cst_19 : f32 to vector<1x128xf32>
    %39 = arith.mulf %38, %37 : vector<1x128xf32>
    %cst_20 = arith.constant 1.000000e+00 : f32
    %40 = vector.broadcast %cst_20 : f32 to vector<1x128xf32>
    %41 = arith.subf %39, %40 : vector<1x128xf32>
    %42 = arith.mulf %22, %41 : vector<1x128xf32>
    %c1 = arith.constant 1 : index
    %c0_21 = arith.constant 0 : index
    %43 = vector.load %arg8[%c1, %c0_21] : memref<8x512xf32, #tpu.memory_space<vmem>>, vector<1x512xf32>
    %44 = arith.truncf %42 : vector<1x128xf32> to vector<1x128xbf16>
    %c0_22 = arith.constant 0 : index
    %c0_23 = arith.constant 0 : index
    %45 = vector.load %arg7[%c0_22, %c0_23] : memref<128x512xbf16, #tpu.memory_space<vmem>>, vector<128x512xbf16>
    %cst_24 = arith.constant dense<0.000000e+00> : vector<1x512xf32>
    %46 = tpu.matmul %44, %45, %cst_24 {dimension_numbers = #tpu.dot_dimension_numbers<[1], [0], [0], [1], [0, 0, 1, 1], [], []>} : vector<1x128xbf16>, vector<128x512xbf16>, vector<1x512xf32> -> vector<1x512xf32>
    %47 = arith.addf %43, %46 : vector<1x512xf32>
    %48 = arith.negf %47 : vector<1x512xf32>
    %49 = math.exp %48 : vector<1x512xf32>
    %cst_25 = arith.constant 1.000000e+00 : f32
    %50 = vector.broadcast %cst_25 : f32 to vector<1x512xf32>
    %51 = arith.addf %50, %49 : vector<1x512xf32>
    %52 = arith.divf %50, %51 : vector<1x512xf32>
    %53 = vector.extract_strided_slice %52 {offsets = [0, 0], sizes = [1, 128], strides = [1, 1]} : vector<1x512xf32> to vector<1x128xf32>
    %54 = vector.extract_strided_slice %52 {offsets = [0, 128], sizes = [1, 128], strides = [1, 1]} : vector<1x512xf32> to vector<1x128xf32>
    %55 = vector.extract_strided_slice %52 {offsets = [0, 256], sizes = [1, 128], strides = [1, 1]} : vector<1x512xf32> to vector<1x128xf32>
    %56 = vector.extract_strided_slice %52 {offsets = [0, 384], sizes = [1, 128], strides = [1, 1]} : vector<1x512xf32> to vector<1x128xf32>
    %cst_26 = arith.constant 2.000000e+00 : f32
    %57 = vector.broadcast %cst_26 : f32 to vector<1x128xf32>
    %58 = arith.mulf %57, %56 : vector<1x128xf32>
    %cst_27 = arith.constant 1.000000e+00 : f32
    %59 = vector.broadcast %cst_27 : f32 to vector<1x128xf32>
    %60 = arith.subf %58, %59 : vector<1x128xf32>
    %61 = arith.mulf %54, %30 : vector<1x128xf32>
    %62 = arith.mulf %53, %60 : vector<1x128xf32>
    %63 = arith.addf %61, %62 : vector<1x128xf32>
    %cst_28 = arith.constant 2.000000e+00 : f32
    %64 = vector.broadcast %cst_28 : f32 to vector<1x128xf32>
    %65 = arith.mulf %64, %63 : vector<1x128xf32>
    %66 = arith.negf %65 : vector<1x128xf32>
    %67 = math.exp %66 : vector<1x128xf32>
    %cst_29 = arith.constant 1.000000e+00 : f32
    %68 = vector.broadcast %cst_29 : f32 to vector<1x128xf32>
    %69 = arith.addf %68, %67 : vector<1x128xf32>
    %70 = arith.divf %68, %69 : vector<1x128xf32>
    %cst_30 = arith.constant 2.000000e+00 : f32
    %71 = vector.broadcast %cst_30 : f32 to vector<1x128xf32>
    %72 = arith.mulf %71, %70 : vector<1x128xf32>
    %cst_31 = arith.constant 1.000000e+00 : f32
    %73 = vector.broadcast %cst_31 : f32 to vector<1x128xf32>
    %74 = arith.subf %72, %73 : vector<1x128xf32>
    %75 = arith.mulf %55, %74 : vector<1x128xf32>
    %c2 = arith.constant 2 : index
    %c0_32 = arith.constant 0 : index
    %76 = vector.load %arg8[%c2, %c0_32] : memref<8x512xf32, #tpu.memory_space<vmem>>, vector<1x512xf32>
    %77 = arith.truncf %75 : vector<1x128xf32> to vector<1x128xbf16>
    %c0_33 = arith.constant 0 : index
    %c0_34 = arith.constant 0 : index
    %78 = vector.load %arg7[%c0_33, %c0_34] : memref<128x512xbf16, #tpu.memory_space<vmem>>, vector<128x512xbf16>
    %cst_35 = arith.constant dense<0.000000e+00> : vector<1x512xf32>
    %79 = tpu.matmul %77, %78, %cst_35 {dimension_numbers = #tpu.dot_dimension_numbers<[1], [0], [0], [1], [0, 0, 1, 1], [], []>} : vector<1x128xbf16>, vector<128x512xbf16>, vector<1x512xf32> -> vector<1x512xf32>
    %80 = arith.addf %76, %79 : vector<1x512xf32>
    %81 = arith.negf %80 : vector<1x512xf32>
    %82 = math.exp %81 : vector<1x512xf32>
    %cst_36 = arith.constant 1.000000e+00 : f32
    %83 = vector.broadcast %cst_36 : f32 to vector<1x512xf32>
    %84 = arith.addf %83, %82 : vector<1x512xf32>
    %85 = arith.divf %83, %84 : vector<1x512xf32>
    %86 = vector.extract_strided_slice %85 {offsets = [0, 0], sizes = [1, 128], strides = [1, 1]} : vector<1x512xf32> to vector<1x128xf32>
    %87 = vector.extract_strided_slice %85 {offsets = [0, 128], sizes = [1, 128], strides = [1, 1]} : vector<1x512xf32> to vector<1x128xf32>
    %88 = vector.extract_strided_slice %85 {offsets = [0, 256], sizes = [1, 128], strides = [1, 1]} : vector<1x512xf32> to vector<1x128xf32>
    %89 = vector.extract_strided_slice %85 {offsets = [0, 384], sizes = [1, 128], strides = [1, 1]} : vector<1x512xf32> to vector<1x128xf32>
    %cst_37 = arith.constant 2.000000e+00 : f32
    %90 = vector.broadcast %cst_37 : f32 to vector<1x128xf32>
    %91 = arith.mulf %90, %89 : vector<1x128xf32>
    %cst_38 = arith.constant 1.000000e+00 : f32
    %92 = vector.broadcast %cst_38 : f32 to vector<1x128xf32>
    %93 = arith.subf %91, %92 : vector<1x128xf32>
    %94 = arith.mulf %87, %63 : vector<1x128xf32>
    %95 = arith.mulf %86, %93 : vector<1x128xf32>
    %96 = arith.addf %94, %95 : vector<1x128xf32>
    %cst_39 = arith.constant 2.000000e+00 : f32
    %97 = vector.broadcast %cst_39 : f32 to vector<1x128xf32>
    %98 = arith.mulf %97, %96 : vector<1x128xf32>
    %99 = arith.negf %98 : vector<1x128xf32>
    %100 = math.exp %99 : vector<1x128xf32>
    %cst_40 = arith.constant 1.000000e+00 : f32
    %101 = vector.broadcast %cst_40 : f32 to vector<1x128xf32>
    %102 = arith.addf %101, %100 : vector<1x128xf32>
    %103 = arith.divf %101, %102 : vector<1x128xf32>
    %cst_41 = arith.constant 2.000000e+00 : f32
    %104 = vector.broadcast %cst_41 : f32 to vector<1x128xf32>
    %105 = arith.mulf %104, %103 : vector<1x128xf32>
    %cst_42 = arith.constant 1.000000e+00 : f32
    %106 = vector.broadcast %cst_42 : f32 to vector<1x128xf32>
    %107 = arith.subf %105, %106 : vector<1x128xf32>
    %108 = arith.mulf %88, %107 : vector<1x128xf32>
    %c3 = arith.constant 3 : index
    %c0_43 = arith.constant 0 : index
    %109 = vector.load %arg8[%c3, %c0_43] : memref<8x512xf32, #tpu.memory_space<vmem>>, vector<1x512xf32>
    %110 = arith.truncf %108 : vector<1x128xf32> to vector<1x128xbf16>
    %c0_44 = arith.constant 0 : index
    %c0_45 = arith.constant 0 : index
    %111 = vector.load %arg7[%c0_44, %c0_45] : memref<128x512xbf16, #tpu.memory_space<vmem>>, vector<128x512xbf16>
    %cst_46 = arith.constant dense<0.000000e+00> : vector<1x512xf32>
    %112 = tpu.matmul %110, %111, %cst_46 {dimension_numbers = #tpu.dot_dimension_numbers<[1], [0], [0], [1], [0, 0, 1, 1], [], []>} : vector<1x128xbf16>, vector<128x512xbf16>, vector<1x512xf32> -> vector<1x512xf32>
    %113 = arith.addf %109, %112 : vector<1x512xf32>
    %114 = arith.negf %113 : vector<1x512xf32>
    %115 = math.exp %114 : vector<1x512xf32>
    %cst_47 = arith.constant 1.000000e+00 : f32
    %116 = vector.broadcast %cst_47 : f32 to vector<1x512xf32>
    %117 = arith.addf %116, %115 : vector<1x512xf32>
    %118 = arith.divf %116, %117 : vector<1x512xf32>
    %119 = vector.extract_strided_slice %118 {offsets = [0, 0], sizes = [1, 128], strides = [1, 1]} : vector<1x512xf32> to vector<1x128xf32>
    %120 = vector.extract_strided_slice %118 {offsets = [0, 128], sizes = [1, 128], strides = [1, 1]} : vector<1x512xf32> to vector<1x128xf32>
    %121 = vector.extract_strided_slice %118 {offsets = [0, 256], sizes = [1, 128], strides = [1, 1]} : vector<1x512xf32> to vector<1x128xf32>
    %122 = vector.extract_strided_slice %118 {offsets = [0, 384], sizes = [1, 128], strides = [1, 1]} : vector<1x512xf32> to vector<1x128xf32>
    %cst_48 = arith.constant 2.000000e+00 : f32
    %123 = vector.broadcast %cst_48 : f32 to vector<1x128xf32>
    %124 = arith.mulf %123, %122 : vector<1x128xf32>
    %cst_49 = arith.constant 1.000000e+00 : f32
    %125 = vector.broadcast %cst_49 : f32 to vector<1x128xf32>
    %126 = arith.subf %124, %125 : vector<1x128xf32>
    %127 = arith.mulf %120, %96 : vector<1x128xf32>
    %128 = arith.mulf %119, %126 : vector<1x128xf32>
    %129 = arith.addf %127, %128 : vector<1x128xf32>
    %cst_50 = arith.constant 2.000000e+00 : f32
    %130 = vector.broadcast %cst_50 : f32 to vector<1x128xf32>
    %131 = arith.mulf %130, %129 : vector<1x128xf32>
    %132 = arith.negf %131 : vector<1x128xf32>
    %133 = math.exp %132 : vector<1x128xf32>
    %cst_51 = arith.constant 1.000000e+00 : f32
    %134 = vector.broadcast %cst_51 : f32 to vector<1x128xf32>
    %135 = arith.addf %134, %133 : vector<1x128xf32>
    %136 = arith.divf %134, %135 : vector<1x128xf32>
    %cst_52 = arith.constant 2.000000e+00 : f32
    %137 = vector.broadcast %cst_52 : f32 to vector<1x128xf32>
    %138 = arith.mulf %137, %136 : vector<1x128xf32>
    %cst_53 = arith.constant 1.000000e+00 : f32
    %139 = vector.broadcast %cst_53 : f32 to vector<1x128xf32>
    %140 = arith.subf %138, %139 : vector<1x128xf32>
    %141 = arith.mulf %121, %140 : vector<1x128xf32>
    %c4 = arith.constant 4 : index
    %c0_54 = arith.constant 0 : index
    %142 = vector.load %arg8[%c4, %c0_54] : memref<8x512xf32, #tpu.memory_space<vmem>>, vector<1x512xf32>
    %143 = arith.truncf %141 : vector<1x128xf32> to vector<1x128xbf16>
    %c0_55 = arith.constant 0 : index
    %c0_56 = arith.constant 0 : index
    %144 = vector.load %arg7[%c0_55, %c0_56] : memref<128x512xbf16, #tpu.memory_space<vmem>>, vector<128x512xbf16>
    %cst_57 = arith.constant dense<0.000000e+00> : vector<1x512xf32>
    %145 = tpu.matmul %143, %144, %cst_57 {dimension_numbers = #tpu.dot_dimension_numbers<[1], [0], [0], [1], [0, 0, 1, 1], [], []>} : vector<1x128xbf16>, vector<128x512xbf16>, vector<1x512xf32> -> vector<1x512xf32>
    %146 = arith.addf %142, %145 : vector<1x512xf32>
    %147 = arith.negf %146 : vector<1x512xf32>
    %148 = math.exp %147 : vector<1x512xf32>
    %cst_58 = arith.constant 1.000000e+00 : f32
    %149 = vector.broadcast %cst_58 : f32 to vector<1x512xf32>
    %150 = arith.addf %149, %148 : vector<1x512xf32>
    %151 = arith.divf %149, %150 : vector<1x512xf32>
    %152 = vector.extract_strided_slice %151 {offsets = [0, 0], sizes = [1, 128], strides = [1, 1]} : vector<1x512xf32> to vector<1x128xf32>
    %153 = vector.extract_strided_slice %151 {offsets = [0, 128], sizes = [1, 128], strides = [1, 1]} : vector<1x512xf32> to vector<1x128xf32>
    %154 = vector.extract_strided_slice %151 {offsets = [0, 256], sizes = [1, 128], strides = [1, 1]} : vector<1x512xf32> to vector<1x128xf32>
    %155 = vector.extract_strided_slice %151 {offsets = [0, 384], sizes = [1, 128], strides = [1, 1]} : vector<1x512xf32> to vector<1x128xf32>
    %cst_59 = arith.constant 2.000000e+00 : f32
    %156 = vector.broadcast %cst_59 : f32 to vector<1x128xf32>
    %157 = arith.mulf %156, %155 : vector<1x128xf32>
    %cst_60 = arith.constant 1.000000e+00 : f32
    %158 = vector.broadcast %cst_60 : f32 to vector<1x128xf32>
    %159 = arith.subf %157, %158 : vector<1x128xf32>
    %160 = arith.mulf %153, %129 : vector<1x128xf32>
    %161 = arith.mulf %152, %159 : vector<1x128xf32>
    %162 = arith.addf %160, %161 : vector<1x128xf32>
    %cst_61 = arith.constant 2.000000e+00 : f32
    %163 = vector.broadcast %cst_61 : f32 to vector<1x128xf32>
    %164 = arith.mulf %163, %162 : vector<1x128xf32>
    %165 = arith.negf %164 : vector<1x128xf32>
    %166 = math.exp %165 : vector<1x128xf32>
    %cst_62 = arith.constant 1.000000e+00 : f32
    %167 = vector.broadcast %cst_62 : f32 to vector<1x128xf32>
    %168 = arith.addf %167, %166 : vector<1x128xf32>
    %169 = arith.divf %167, %168 : vector<1x128xf32>
    %cst_63 = arith.constant 2.000000e+00 : f32
    %170 = vector.broadcast %cst_63 : f32 to vector<1x128xf32>
    %171 = arith.mulf %170, %169 : vector<1x128xf32>
    %cst_64 = arith.constant 1.000000e+00 : f32
    %172 = vector.broadcast %cst_64 : f32 to vector<1x128xf32>
    %173 = arith.subf %171, %172 : vector<1x128xf32>
    %174 = arith.mulf %154, %173 : vector<1x128xf32>
    %c5 = arith.constant 5 : index
    %c0_65 = arith.constant 0 : index
    %175 = vector.load %arg8[%c5, %c0_65] : memref<8x512xf32, #tpu.memory_space<vmem>>, vector<1x512xf32>
    %176 = arith.truncf %174 : vector<1x128xf32> to vector<1x128xbf16>
    %c0_66 = arith.constant 0 : index
    %c0_67 = arith.constant 0 : index
    %177 = vector.load %arg7[%c0_66, %c0_67] : memref<128x512xbf16, #tpu.memory_space<vmem>>, vector<128x512xbf16>
    %cst_68 = arith.constant dense<0.000000e+00> : vector<1x512xf32>
    %178 = tpu.matmul %176, %177, %cst_68 {dimension_numbers = #tpu.dot_dimension_numbers<[1], [0], [0], [1], [0, 0, 1, 1], [], []>} : vector<1x128xbf16>, vector<128x512xbf16>, vector<1x512xf32> -> vector<1x512xf32>
    %179 = arith.addf %175, %178 : vector<1x512xf32>
    %180 = arith.negf %179 : vector<1x512xf32>
    %181 = math.exp %180 : vector<1x512xf32>
    %cst_69 = arith.constant 1.000000e+00 : f32
    %182 = vector.broadcast %cst_69 : f32 to vector<1x512xf32>
    %183 = arith.addf %182, %181 : vector<1x512xf32>
    %184 = arith.divf %182, %183 : vector<1x512xf32>
    %185 = vector.extract_strided_slice %184 {offsets = [0, 0], sizes = [1, 128], strides = [1, 1]} : vector<1x512xf32> to vector<1x128xf32>
    %186 = vector.extract_strided_slice %184 {offsets = [0, 128], sizes = [1, 128], strides = [1, 1]} : vector<1x512xf32> to vector<1x128xf32>
    %187 = vector.extract_strided_slice %184 {offsets = [0, 256], sizes = [1, 128], strides = [1, 1]} : vector<1x512xf32> to vector<1x128xf32>
    %188 = vector.extract_strided_slice %184 {offsets = [0, 384], sizes = [1, 128], strides = [1, 1]} : vector<1x512xf32> to vector<1x128xf32>
    %cst_70 = arith.constant 2.000000e+00 : f32
    %189 = vector.broadcast %cst_70 : f32 to vector<1x128xf32>
    %190 = arith.mulf %189, %188 : vector<1x128xf32>
    %cst_71 = arith.constant 1.000000e+00 : f32
    %191 = vector.broadcast %cst_71 : f32 to vector<1x128xf32>
    %192 = arith.subf %190, %191 : vector<1x128xf32>
    %193 = arith.mulf %186, %162 : vector<1x128xf32>
    %194 = arith.mulf %185, %192 : vector<1x128xf32>
    %195 = arith.addf %193, %194 : vector<1x128xf32>
    %cst_72 = arith.constant 2.000000e+00 : f32
    %196 = vector.broadcast %cst_72 : f32 to vector<1x128xf32>
    %197 = arith.mulf %196, %195 : vector<1x128xf32>
    %198 = arith.negf %197 : vector<1x128xf32>
    %199 = math.exp %198 : vector<1x128xf32>
    %cst_73 = arith.constant 1.000000e+00 : f32
    %200 = vector.broadcast %cst_73 : f32 to vector<1x128xf32>
    %201 = arith.addf %200, %199 : vector<1x128xf32>
    %202 = arith.divf %200, %201 : vector<1x128xf32>
    %cst_74 = arith.constant 2.000000e+00 : f32
    %203 = vector.broadcast %cst_74 : f32 to vector<1x128xf32>
    %204 = arith.mulf %203, %202 : vector<1x128xf32>
    %cst_75 = arith.constant 1.000000e+00 : f32
    %205 = vector.broadcast %cst_75 : f32 to vector<1x128xf32>
    %206 = arith.subf %204, %205 : vector<1x128xf32>
    %207 = arith.mulf %187, %206 : vector<1x128xf32>
    %c6 = arith.constant 6 : index
    %c0_76 = arith.constant 0 : index
    %208 = vector.load %arg8[%c6, %c0_76] : memref<8x512xf32, #tpu.memory_space<vmem>>, vector<1x512xf32>
    %209 = arith.truncf %207 : vector<1x128xf32> to vector<1x128xbf16>
    %c0_77 = arith.constant 0 : index
    %c0_78 = arith.constant 0 : index
    %210 = vector.load %arg7[%c0_77, %c0_78] : memref<128x512xbf16, #tpu.memory_space<vmem>>, vector<128x512xbf16>
    %cst_79 = arith.constant dense<0.000000e+00> : vector<1x512xf32>
    %211 = tpu.matmul %209, %210, %cst_79 {dimension_numbers = #tpu.dot_dimension_numbers<[1], [0], [0], [1], [0, 0, 1, 1], [], []>} : vector<1x128xbf16>, vector<128x512xbf16>, vector<1x512xf32> -> vector<1x512xf32>
    %212 = arith.addf %208, %211 : vector<1x512xf32>
    %213 = arith.negf %212 : vector<1x512xf32>
    %214 = math.exp %213 : vector<1x512xf32>
    %cst_80 = arith.constant 1.000000e+00 : f32
    %215 = vector.broadcast %cst_80 : f32 to vector<1x512xf32>
    %216 = arith.addf %215, %214 : vector<1x512xf32>
    %217 = arith.divf %215, %216 : vector<1x512xf32>
    %218 = vector.extract_strided_slice %217 {offsets = [0, 0], sizes = [1, 128], strides = [1, 1]} : vector<1x512xf32> to vector<1x128xf32>
    %219 = vector.extract_strided_slice %217 {offsets = [0, 128], sizes = [1, 128], strides = [1, 1]} : vector<1x512xf32> to vector<1x128xf32>
    %220 = vector.extract_strided_slice %217 {offsets = [0, 256], sizes = [1, 128], strides = [1, 1]} : vector<1x512xf32> to vector<1x128xf32>
    %221 = vector.extract_strided_slice %217 {offsets = [0, 384], sizes = [1, 128], strides = [1, 1]} : vector<1x512xf32> to vector<1x128xf32>
    %cst_81 = arith.constant 2.000000e+00 : f32
    %222 = vector.broadcast %cst_81 : f32 to vector<1x128xf32>
    %223 = arith.mulf %222, %221 : vector<1x128xf32>
    %cst_82 = arith.constant 1.000000e+00 : f32
    %224 = vector.broadcast %cst_82 : f32 to vector<1x128xf32>
    %225 = arith.subf %223, %224 : vector<1x128xf32>
    %226 = arith.mulf %219, %195 : vector<1x128xf32>
    %227 = arith.mulf %218, %225 : vector<1x128xf32>
    %228 = arith.addf %226, %227 : vector<1x128xf32>
    %cst_83 = arith.constant 2.000000e+00 : f32
    %229 = vector.broadcast %cst_83 : f32 to vector<1x128xf32>
    %230 = arith.mulf %229, %228 : vector<1x128xf32>
    %231 = arith.negf %230 : vector<1x128xf32>
    %232 = math.exp %231 : vector<1x128xf32>
    %cst_84 = arith.constant 1.000000e+00 : f32
    %233 = vector.broadcast %cst_84 : f32 to vector<1x128xf32>
    %234 = arith.addf %233, %232 : vector<1x128xf32>
    %235 = arith.divf %233, %234 : vector<1x128xf32>
    %cst_85 = arith.constant 2.000000e+00 : f32
    %236 = vector.broadcast %cst_85 : f32 to vector<1x128xf32>
    %237 = arith.mulf %236, %235 : vector<1x128xf32>
    %cst_86 = arith.constant 1.000000e+00 : f32
    %238 = vector.broadcast %cst_86 : f32 to vector<1x128xf32>
    %239 = arith.subf %237, %238 : vector<1x128xf32>
    %240 = arith.mulf %220, %239 : vector<1x128xf32>
    %c7 = arith.constant 7 : index
    %c0_87 = arith.constant 0 : index
    %241 = vector.load %arg8[%c7, %c0_87] : memref<8x512xf32, #tpu.memory_space<vmem>>, vector<1x512xf32>
    %242 = arith.truncf %240 : vector<1x128xf32> to vector<1x128xbf16>
    %c0_88 = arith.constant 0 : index
    %c0_89 = arith.constant 0 : index
    %243 = vector.load %arg7[%c0_88, %c0_89] : memref<128x512xbf16, #tpu.memory_space<vmem>>, vector<128x512xbf16>
    %cst_90 = arith.constant dense<0.000000e+00> : vector<1x512xf32>
    %244 = tpu.matmul %242, %243, %cst_90 {dimension_numbers = #tpu.dot_dimension_numbers<[1], [0], [0], [1], [0, 0, 1, 1], [], []>} : vector<1x128xbf16>, vector<128x512xbf16>, vector<1x512xf32> -> vector<1x512xf32>
    %245 = arith.addf %241, %244 : vector<1x512xf32>
    %246 = arith.negf %245 : vector<1x512xf32>
    %247 = math.exp %246 : vector<1x512xf32>
    %cst_91 = arith.constant 1.000000e+00 : f32
    %248 = vector.broadcast %cst_91 : f32 to vector<1x512xf32>
    %249 = arith.addf %248, %247 : vector<1x512xf32>
    %250 = arith.divf %248, %249 : vector<1x512xf32>
    %251 = vector.extract_strided_slice %250 {offsets = [0, 0], sizes = [1, 128], strides = [1, 1]} : vector<1x512xf32> to vector<1x128xf32>
    %252 = vector.extract_strided_slice %250 {offsets = [0, 128], sizes = [1, 128], strides = [1, 1]} : vector<1x512xf32> to vector<1x128xf32>
    %253 = vector.extract_strided_slice %250 {offsets = [0, 256], sizes = [1, 128], strides = [1, 1]} : vector<1x512xf32> to vector<1x128xf32>
    %254 = vector.extract_strided_slice %250 {offsets = [0, 384], sizes = [1, 128], strides = [1, 1]} : vector<1x512xf32> to vector<1x128xf32>
    %cst_92 = arith.constant 2.000000e+00 : f32
    %255 = vector.broadcast %cst_92 : f32 to vector<1x128xf32>
    %256 = arith.mulf %255, %254 : vector<1x128xf32>
    %cst_93 = arith.constant 1.000000e+00 : f32
    %257 = vector.broadcast %cst_93 : f32 to vector<1x128xf32>
    %258 = arith.subf %256, %257 : vector<1x128xf32>
    %259 = arith.mulf %252, %228 : vector<1x128xf32>
    %260 = arith.mulf %251, %258 : vector<1x128xf32>
    %261 = arith.addf %259, %260 : vector<1x128xf32>
    %cst_94 = arith.constant 2.000000e+00 : f32
    %262 = vector.broadcast %cst_94 : f32 to vector<1x128xf32>
    %263 = arith.mulf %262, %261 : vector<1x128xf32>
    %264 = arith.negf %263 : vector<1x128xf32>
    %265 = math.exp %264 : vector<1x128xf32>
    %cst_95 = arith.constant 1.000000e+00 : f32
    %266 = vector.broadcast %cst_95 : f32 to vector<1x128xf32>
    %267 = arith.addf %266, %265 : vector<1x128xf32>
    %268 = arith.divf %266, %267 : vector<1x128xf32>
    %cst_96 = arith.constant 2.000000e+00 : f32
    %269 = vector.broadcast %cst_96 : f32 to vector<1x128xf32>
    %270 = arith.mulf %269, %268 : vector<1x128xf32>
    %cst_97 = arith.constant 1.000000e+00 : f32
    %271 = vector.broadcast %cst_97 : f32 to vector<1x128xf32>
    %272 = arith.subf %270, %271 : vector<1x128xf32>
    %273 = arith.mulf %253, %272 : vector<1x128xf32>
    %c0_98 = arith.constant 0 : index
    %c0_99 = arith.constant 0 : index
    %274 = vector.load %arg4[%c0_98, %c0_99] : memref<1x128xf32, #tpu.memory_space<vmem>>, vector<1x128xf32>
    %275 = arith.mulf %273, %274 : vector<1x128xf32>
    %cst_100 = arith.constant dense<0.000000e+00> : vector<1xf32>
    %276 = vector.multi_reduction <add>, %275, %cst_100 [1] : vector<1x128xf32> to vector<1xf32>
    %277 = vector.shape_cast %276 : vector<1xf32> to vector<1x1xf32>
    %c0_101 = arith.constant 0 : index
    %c0_102 = arith.constant 0 : index
    %278 = vector.load %arg5[%c0_101, %c0_102] : memref<1x1xf32, #tpu.memory_space<vmem>>, vector<1x1xf32>
    %279 = arith.addf %277, %278 : vector<1x1xf32>
    %c0_103 = arith.constant 0 : index
    %c0_104 = arith.constant 0 : index
    %280 = vector.load %arg6[%c0_103, %c0_104] : memref<1x1xf32, #tpu.memory_space<vmem>>, vector<1x1xf32>
    tpu.vector_store %arg6[%c0_103, %c0_104], %279 {strides = array<i32>} : memref<1x1xf32, #tpu.memory_space<vmem>>, vector<1x1xf32>,
    return
  }
}

</mosaic_0001>

<bundles_post_ra>
// kernel: tpu_custom_call.1
= control target key start
LH: loop header
LB: loop body
LE: loop exit
PB: predicated region body
PF: predicated region fallthrough
CT: control target
= control target key end

     0   :  { %s2368_s0 = inlined_call_operand.hbm [shape: f32[8,128], index: 0, kind: input, shape index: {}]   ;;  %s2369_s1 = inlined_call_operand.hbm [shape: bf16[128,512], index: 1, kind: input, shape index: {}]   ;;  %s2370_s2 = inlined_call_operand.hbm [shape: bf16[128,512], index: 2, kind: input, shape index: {}]   ;;  %s2371_s3 = inlined_call_operand.vmem [shape: f32[1,512], index: 3, kind: input, shape index: {}]   ;;  %s2372_s4 = inlined_call_operand.vmem [shape: f32[1,128], index: 4, kind: input, shape index: {}]   ;;  %s2373_s5 = inlined_call_operand.<no memory space> [shape: f32[1,1], index: 5, kind: input, shape index: {}]   ;;  %s2374_s6 = inlined_call_operand.hbm [shape: f32[1,1], index: 6, kind: output, shape index: {}]  }
   0x1   :  { %v11_v0 = vstv %s2373_s5 }
   0x2   :  { %12 = vst [vmem:[#allocation5] sm:$0x1] %v11_v0 }
   0x3   :  { %13 = vsyncpa [#allocation7], 0 }
   0x4   :  { %14 = vsyncpa [#allocation10], 0 }
   0x5   :  { %15 = vsyncpa [#allocation8], 0  ;;  %s1890_s23 = smov [#allocation6]   ;;  %s1891_s25 = smov [#allocation9]  }
   0x6   :  { %s22_s24 = sshll.u32 %s1890_s23, 4  ;;  %s31_s26 = sshll.u32 %s1891_s25, 4  ;;  %s23_s24 = int_to_ptr.vmem [resolvable:$true] %s22_s24  ;;  %s1943_s26 = int_to_ptr.vmem [resolvable:$true] %s31_s26 }
   0x7   :  { %s1816_s29 = scalar_lea.hbm %s2368_s0, 128 }
   0x8   :  { %p1817_p0 = scmp.ne.s32.totalorder %s2368_s0, %s1816_s29  ;;  %p1820_p1 = scmp.lt.u32.totalorder %s1816_s29, %s2368_s0 }
   0xa   :  { %p1822_p2 = pnand %p1820_p1, %p1817_p0 }
   0xc   :  { %1825 = shalt.err (!%p1822_p2)
}
   0xd   :  { %s1826_s9 = scalar_lea.vmem %s23_s24, 128  ;;  %p1831_p4 = scmp.lt.s32.totalorder %s23_s24, %s23_s24 }
   0xe   :  { %p1827_p3 = scmp.ne.s32.totalorder %s23_s24, %s1826_s9  ;;  %p1832_p5 = scmp.lt.s32.totalorder %s1826_s9, %s1826_s9 }
  0x10   :  { %p1833_p6 = por %p1832_p5, %p1831_p4 }
  0x12   :  { %p1834_p7 = pnand %p1833_p6, %p1827_p3 }
  0x14   :  { %1837 = shalt.err (!%p1834_p7)
}
  0x15   :  { %25 = dma.hbm_to_vmem [thread:$0]  %s2368_s0, 128, %s23_s24, [#allocation7]  }
  0x16   :  { %s1838_s14 = scalar_lea.hbm %s2369_s1, 4096 }
  0x17   :  { %p1839_p8 = scmp.ne.s32.totalorder %s2369_s1, %s1838_s14  ;;  %p1842_p9 = scmp.lt.u32.totalorder %s1838_s14, %s2369_s1 }
  0x19   :  { %p1844_p10 = pnand %p1842_p9, %p1839_p8 }
  0x1b   :  { %1847 = shalt.err (!%p1844_p10)
}
  0x1c   :  { %s1848_s19 = scalar_lea.vmem %s1943_s26, 4096  ;;  %p1853_p12 = scmp.lt.s32.totalorder %s1943_s26, %s1943_s26 }
  0x1d   :  { %p1849_p11 = scmp.ne.s32.totalorder %s1943_s26, %s1848_s19  ;;  %p1854_p13 = scmp.lt.s32.totalorder %s1848_s19, %s1848_s19 }
  0x1f   :  { %p1855_p0 = por %p1854_p13, %p1853_p12 }
  0x21   :  { %p1856_p1 = pnand %p1855_p0, %p1849_p11 }
  0x23   :  { %1859 = shalt.err (!%p1856_p1)
}
  0x24   :  { %s1892_s0 = smov 256   ;;  %s1893_s20 = smov 16  }
  0x25   :  { %37 = dma.hbm_to_vmem [thread:$0]  %s2369_s1, 4096, %s1943_s26, [#allocation10], %s1892_s0, %s1892_s0, %s1893_s20  }
  0x26   :  { %1882 = dma.done.wait [#allocation7], 128  }
  0x27   :  { %1883 = vsyncadd [#allocation7], 4294967168 }
  0x28   :  { %1884 = dma.done.wait [#allocation10], 4096  }
  0x29   :  { %1885 = vsyncadd [#allocation10], 4294963200  ;;  %s55_s23 = sld [smem:[#allocation0]]   ;;  %s1894_s24 = smov 512   ;;  %v1895_v1 = vmov 0   ;;  %v122_v36 = vlaneseq }
  0x2a   :  { %67 = sst [smem:[#allocation13]] %s1894_s24  ;;  %334 = vmatprep.mubr.bf16.mxu0 %v1895_v1  ;;  %375 = vmatprep.mubr.bf16.mxu1 %v1895_v1  ;;  %s1896_s25 = smov 4  }
  0x2b   :  { %69 = sst [smem:[#allocation13 + $0x1]] %s1894_s24  ;;  %s1897_s27 = smov 64   ;;  %v1979_v37 = vshrl.u32 %v122_v36, 7 }
  0x2c   :  { %71 = sst [smem:[#allocation13 + $0x2]] %s1896_s25  ;;  %s1898_s28 = smov 128  }
  0x2d   :  { %73 = sst [smem:[#allocation13 + $0x3]] %s1897_s27  ;;  %s1899_s1 = smov 2   ;;  %v124_v38 = vsub.s32 0, %v1979_v37  ;;  %v132_v39 = vsub.s32 2, %v1979_v37  ;;  %v128_v41 = vsub.s32 1, %v1979_v37  ;;  %v136_v42 = vsub.s32 3, %v1979_v37 }
  0x2e   :  { %75 = sst [smem:[#allocation13 + $0x4]] %s1898_s28  ;;  %s1900_s26 = smov [#allocation2]  }
  0x2f   :  { %77 = sst [smem:[#allocation13 + $0x5]] %s1899_s1  ;;  %s63_s29 = sshll.u32 %s1900_s26, 4  ;;  %s64_s29 = int_to_ptr.vmem [resolvable:$true] %s63_s29 }
  0x30   :  { %s1598_s30 = sshll.u32 %s55_s23, 26  ;;  %79 = sst [smem:[#allocation13 + $0x6]] %s1892_s0 }
  0x31   :  { %s1599_s7 = sadd.s32 134217728, %s1598_s30  ;;  %81 = sst [smem:[#allocation13 + $0x7]] %s1897_s27 }
  0x32   :  { %83 = sst [smem:[#allocation13 + $0x8]] %s1896_s25  ;;  %s1901_s5 = smov [#allocation4]  }
  0x33   :  { %s1902_s8 = smov [#allocation12]  }
  0x34   :  { %85 = dma.general %s2370_s2, 4096, %s64_s29, %s1901_s5, %s1902_s8, [#allocation13], %s1599_s7, 0  }
  0x35   :  { %v1680_v2 = vld [vmem:[#allocation9 + $0x4] ss:$16 sps:$4 sm:$0xff]   ;;  %v1682_v3 = vld [vmem:[#allocation9 + $0xc] ss:$16 sps:$4 sm:$0xff]   ;;  %v1684_v4 = vld [vmem:[#allocation9] ss:$16 sps:$4 sm:$0xff]  }
  0x36   :  { %302 = vmatprep.subr.bf16.mxu0 %v1680_v2  ;;  %v1685_v5 = vld [vmem:[#allocation9 + $0x8] ss:$16 sps:$4 sm:$0xff]   ;;  %343 = vmatprep.subr.bf16.mxu1 %v1682_v3  ;;  %v1686_v6 = vld [vmem:[#allocation9 + $0x24] ss:$16 sps:$4 sm:$0xff]   ;;  %v1688_v7 = vld [vmem:[#allocation9 + $0x2c] ss:$16 sps:$4 sm:$0xff]  }
  0x37   :  { %303 = vmatpush1.bf16.msra.mxu0 %v1684_v4  ;;  %344 = vmatpush1.bf16.msra.mxu1 %v1685_v5  ;;  %v1690_v8 = vld [vmem:[#allocation9 + $0x20] ss:$16 sps:$4 sm:$0xff]   ;;  %v1691_v9 = vld [vmem:[#allocation9 + $0x28] ss:$16 sps:$4 sm:$0xff]   ;;  %v1692_v10 = vld [vmem:[#allocation9 + $0x44] ss:$16 sps:$4 sm:$0xff]  }
  0x38   :  { %304 = vmatprep.subr.bf16.mxu0 %v1686_v6  ;;  %345 = vmatprep.subr.bf16.mxu1 %v1688_v7  ;;  %v1694_v11 = vld [vmem:[#allocation9 + $0x4c] ss:$16 sps:$4 sm:$0xff]   ;;  %v1696_v12 = vld [vmem:[#allocation9 + $0x40] ss:$16 sps:$4 sm:$0xff]   ;;  %v1697_v13 = vld [vmem:[#allocation9 + $0x48] ss:$16 sps:$4 sm:$0xff]  }
  0x39   :  { %v1698_v14 = vld [vmem:[#allocation9 + $0x64] ss:$16 sps:$4 sm:$0xff]   ;;  %v1700_v15 = vld [vmem:[#allocation9 + $0x6c] ss:$16 sps:$4 sm:$0xff]   ;;  %v1702_v16 = vld [vmem:[#allocation9 + $0x60] ss:$16 sps:$4 sm:$0xff]  }
  0x3a   :  { %v1703_v17 = vld [vmem:[#allocation9 + $0x68] ss:$16 sps:$4 sm:$0xff]   ;;  %v1704_v18 = vld [vmem:[#allocation9 + $0x84] ss:$16 sps:$4 sm:$0xff]   ;;  %v1706_v19 = vld [vmem:[#allocation9 + $0x8c] ss:$16 sps:$4 sm:$0xff]  }
  0x3b   :  { %305 = vmatpush1.bf16.msra.mxu0 %v1690_v8  ;;  %346 = vmatpush1.bf16.msra.mxu1 %v1691_v9  ;;  %v1708_v20 = vld [vmem:[#allocation9 + $0x80] ss:$16 sps:$4 sm:$0xff]   ;;  %v1709_v21 = vld [vmem:[#allocation9 + $0x88] ss:$16 sps:$4 sm:$0xff]   ;;  %v1710_v22 = vld [vmem:[#allocation9 + $0xa4] ss:$16 sps:$4 sm:$0xff]  }
  0x3c   :  { %306 = vmatprep.subr.bf16.mxu0 %v1692_v10  ;;  %347 = vmatprep.subr.bf16.mxu1 %v1694_v11  ;;  %v1712_v23 = vld [vmem:[#allocation9 + $0xac] ss:$16 sps:$4 sm:$0xff]   ;;  %v1714_v24 = vld [vmem:[#allocation9 + $0xa0] ss:$16 sps:$4 sm:$0xff]   ;;  %v1715_v25 = vld [vmem:[#allocation9 + $0xa8] ss:$16 sps:$4 sm:$0xff]  }
  0x3d   :  { %v1716_v26 = vld [vmem:[#allocation9 + $0xc4] ss:$16 sps:$4 sm:$0xff]   ;;  %v1718_v27 = vld [vmem:[#allocation9 + $0xcc] ss:$16 sps:$4 sm:$0xff]   ;;  %v1720_v28 = vld [vmem:[#allocation9 + $0xc0] ss:$16 sps:$4 sm:$0xff]  }
  0x3e   :  { %v1721_v29 = vld [vmem:[#allocation9 + $0xc8] ss:$16 sps:$4 sm:$0xff]   ;;  %v1722_v30 = vld [vmem:[#allocation9 + $0xe4] ss:$16 sps:$4 sm:$0xff]   ;;  %v1724_v31 = vld [vmem:[#allocation9 + $0xec] ss:$16 sps:$4 sm:$0xff]  }
  0x3f   :  { %307 = vmatpush1.bf16.msra.mxu0 %v1696_v12  ;;  %348 = vmatpush1.bf16.msra.mxu1 %v1697_v13  ;;  %v1726_v32 = vld [vmem:[#allocation9 + $0xe0] ss:$16 sps:$4 sm:$0xff]   ;;  %v1727_v33 = vld [vmem:[#allocation9 + $0xe8] ss:$16 sps:$4 sm:$0xff]  }
  0x40   :  { %308 = vmatprep.subr.bf16.mxu0 %v1698_v14  ;;  %349 = vmatprep.subr.bf16.mxu1 %v1700_v15  ;;  %v86_v34 = vld [vmem:[#allocation6] sm:$0xff] }
  0x41   :  { %v87_v35 = vpack.c.bf16 %v86_v34, %v86_v34  ;;  %v120_v40 = vld [vmem:[%s2371_s3] sm:$0xf] }
  0x42   :  { %v125_v43 = vrot.slane %v120_v40, %v124_v38  ;;  %v133_v44 = vrot.slane %v120_v40, %v132_v39  ;;  %v129_v45 = vrot.slane %v120_v40, %v128_v41  ;;  %v137_v46 = vrot.slane %v120_v40, %v136_v42 }
  0x43   :  { %309 = vmatpush1.bf16.msra.mxu0 %v1702_v16  ;;  %350 = vmatpush1.bf16.msra.mxu1 %v1703_v17 }
  0x44   :  { %310 = vmatprep.subr.bf16.mxu0 %v1704_v18  ;;  %351 = vmatprep.subr.bf16.mxu1 %v1706_v19 }
  0x47   :  { %311 = vmatpush1.bf16.msra.mxu0 %v1708_v20  ;;  %352 = vmatpush1.bf16.msra.mxu1 %v1709_v21 }
  0x48   :  { %312 = vmatprep.subr.bf16.mxu0 %v1710_v22  ;;  %353 = vmatprep.subr.bf16.mxu1 %v1712_v23 }
  0x4b   :  { %313 = vmatpush1.bf16.msra.mxu0 %v1714_v24  ;;  %354 = vmatpush1.bf16.msra.mxu1 %v1715_v25 }
  0x4c   :  { %314 = vmatprep.subr.bf16.mxu0 %v1716_v26  ;;  %355 = vmatprep.subr.bf16.mxu1 %v1718_v27 }
  0x4f   :  { %315 = vmatpush1.bf16.msra.mxu0 %v1720_v28  ;;  %356 = vmatpush1.bf16.msra.mxu1 %v1721_v29 }
  0x50   :  { %316 = vmatprep.subr.bf16.mxu0 %v1722_v30  ;;  %357 = vmatprep.subr.bf16.mxu1 %v1724_v31 }
  0x53   :  { %317 = vmatpush1.bf16.msra.mxu0 %v1726_v32  ;;  %358 = vmatpush1.bf16.msra.mxu1 %v1727_v33 }
  0x56   :  { %335 = vmatmul.mubr.bf16.vlgmr.msra.gmra.mrb[0].mxu0 %v87_v35  ;;  %376 = vmatmul.mubr.bf16.vlgmr.msra.gmra.mrb[0].mxu1 %v87_v35 }
 0x129   :  { %v336_v47 = vpop.f32.mrb[0].mxu0  ;;  %v377_v48 = vpop.f32.mrb[0].mxu1 }
 0x12a   :  { %v337_v49 = vadd.f32 %v336_v47, %v125_v43  ;;  %v378_v50 = vadd.f32 %v377_v48, %v133_v44  ;;  %v338_v51 = vpop.f32.mrb[1].mxu0  ;;  %v379_v52 = vpop.f32.mrb[1].mxu1 }
 0x12b   :  { %v339_v53 = vadd.f32 %v338_v51, %v129_v45  ;;  %v380_v54 = vadd.f32 %v379_v52, %v137_v46  ;;  %v340_v55 = vpop.f32.mrb[2].mxu0  ;;  %v381_v56 = vpop.f32.mrb[2].mxu1 }
 0x12c   :  { %384 = vst [vmem:[#allocation3] sm:$0xff] %v337_v49  ;;  %386 = vst [vmem:[#allocation3 + $0x10] sm:$0xff] %v378_v50  ;;  %v341_v57 = vpop.f32.mrb[3].mxu0  ;;  %v382_v58 = vpop.f32.mrb[3].mxu1 }
 0x12d   :  { %385 = vst [vmem:[#allocation3 + $0x8] sm:$0xff] %v339_v53  ;;  %387 = vst [vmem:[#allocation3 + $0x18] sm:$0xff] %v380_v54 }
 0x12e   :  { %1886 = dma.done.wait [#allocation4], 4096 }
 0x12f   :  { %1887 = vsyncadd [#allocation4], 4294963200  ;;  %457 = vmatprep.mubr.bf16.mxu0 %v1895_v1  ;;  %498 = vmatprep.mubr.bf16.mxu1 %v1895_v1  ;;  %v1990_v59 = vld [vmem:[#allocation2 + $0x8] sm:$0xff]  ;;  %v1992_v60 = vld [vmem:[#allocation2 + $0x18] sm:$0xff]  ;;  %v1903_v28 = vmov 1966171168  }
 0x130   :  { %v1994_v61 = vld [vmem:[#allocation2] sm:$0xff]  ;;  %425 = vmatprep.subr.bf16.mxu0 %v1990_v59  ;;  %466 = vmatprep.subr.bf16.mxu1 %v1992_v60  ;;  %v1998_v62 = vld [vmem:[#allocation2 + $0x10] sm:$0xff]  ;;  %v2000_v63 = vld [vmem:[#allocation2 + $0x28] sm:$0xff]  ;;  %v514_v29 = vunpack.c.l.s4 %v1903_v28  ;;  %vm1568_vm0 = vcmask 1040384   ;;  %s1904_s13 = smov [#allocation11]   ;;  %vm1574_vm1 = vcmask 0  }
 0x131   :  { %v2002_v0 = vld [vmem:[#allocation2 + $0x38] sm:$0xff]  ;;  %426 = vmatpush1.bf16.msra.mxu0 %v1994_v61  ;;  %467 = vmatpush1.bf16.msra.mxu1 %v1998_v62  ;;  %v2008_v2 = vld [vmem:[#allocation2 + $0x20] sm:$0xff]  ;;  %v2010_v3 = vld [vmem:[#allocation2 + $0x30] sm:$0xff]  ;;  %s1582_s14 = sshll.u32 %s1904_s13, 4  ;;  %s1583_s14 = int_to_ptr.vmem [resolvable:$true] %s1582_s14 }
 0x132   :  { %427 = vmatprep.subr.bf16.mxu0 %v2000_v63  ;;  %468 = vmatprep.subr.bf16.mxu1 %v2002_v0  ;;  %v2012_v4 = vld [vmem:[#allocation2 + $0x48] sm:$0xff]  ;;  %v2014_v5 = vld [vmem:[#allocation2 + $0x58] sm:$0xff]  ;;  %v2020_v6 = vld [vmem:[#allocation2 + $0x40] sm:$0xff]  ;;  %v515_v30 = vunpack.c.0.s8 %v514_v29  ;;  %s1860_s15 = scalar_lea.vmem %s1583_s14, 16  ;;  %s1864_s16 = scalar_lea.vmem %s1583_s14, 32 }
 0x133   :  { %v2022_v7 = vld [vmem:[#allocation2 + $0x50] sm:$0xff]  ;;  %v2024_v8 = vld [vmem:[#allocation2 + $0x68] sm:$0xff]  ;;  %v2026_v9 = vld [vmem:[#allocation2 + $0x78] sm:$0xff]  ;;  %p1861_p2 = scmp.ne.s32.totalorder %s1583_s14, %s1860_s15  ;;  %p1865_p3 = scmp.lt.s32.totalorder %s1583_s14, %s1583_s14 }
 0x134   :  { %v2032_v10 = vld [vmem:[#allocation2 + $0x60] sm:$0xff]  ;;  %v2034_v11 = vld [vmem:[#allocation2 + $0x70] sm:$0xff]  ;;  %v2036_v12 = vld [vmem:[#allocation2 + $0x88] sm:$0xff]  ;;  %v2125_v33 = vsub.s32 %v515_v30, %v1979_v37  ;;  %p1866_p4 = scmp.lt.s32.totalorder %s1864_s16, %s1860_s15 }
 0x135   :  { %428 = vmatpush1.bf16.msra.mxu0 %v2008_v2  ;;  %469 = vmatpush1.bf16.msra.mxu1 %v2010_v3  ;;  %v2038_v13 = vld [vmem:[#allocation2 + $0x98] sm:$0xff]  ;;  %v2044_v14 = vld [vmem:[#allocation2 + $0x80] sm:$0xff]  ;;  %v2046_v15 = vld [vmem:[#allocation2 + $0x90] sm:$0xff] }
 0x136   :  { %429 = vmatprep.subr.bf16.mxu0 %v2012_v4  ;;  %470 = vmatprep.subr.bf16.mxu1 %v2014_v5  ;;  %v2048_v16 = vld [vmem:[#allocation2 + $0xa8] sm:$0xff]  ;;  %v2050_v17 = vld [vmem:[#allocation2 + $0xb8] sm:$0xff]  ;;  %v2056_v18 = vld [vmem:[#allocation2 + $0xa0] sm:$0xff]  ;;  %p1867_p5 = por %p1866_p4, %p1865_p3 }
 0x137   :  { %v2058_v19 = vld [vmem:[#allocation2 + $0xb0] sm:$0xff]  ;;  %v2060_v20 = vld [vmem:[#allocation2 + $0xc8] sm:$0xff]  ;;  %v2062_v21 = vld [vmem:[#allocation2 + $0xd8] sm:$0xff] }
 0x138   :  { %v2068_v22 = vld [vmem:[#allocation2 + $0xc0] sm:$0xff]  ;;  %v2070_v23 = vld [vmem:[#allocation2 + $0xd0] sm:$0xff]  ;;  %v2072_v24 = vld [vmem:[#allocation2 + $0xe8] sm:$0xff]  ;;  %p1868_p6 = pnand %p1867_p5, %p1861_p2 }
 0x139   :  { %430 = vmatpush1.bf16.msra.mxu0 %v2020_v6  ;;  %471 = vmatpush1.bf16.msra.mxu1 %v2022_v7  ;;  %v2074_v25 = vld [vmem:[#allocation2 + $0xf8] sm:$0xff]  ;;  %v2080_v26 = vld [vmem:[#allocation2 + $0xe0] sm:$0xff]  ;;  %v2082_v27 = vld [vmem:[#allocation2 + $0xf0] sm:$0xff] }
 0x13a   :  { %431 = vmatprep.subr.bf16.mxu0 %v2024_v8  ;;  %472 = vmatprep.subr.bf16.mxu1 %v2026_v9  ;;  %v392_v46 = vld [vmem:[#allocation3] ss:$8 sm:$0xf] }
 0x13d   :  { %432 = vmatpush1.bf16.msra.mxu0 %v2032_v10  ;;  %473 = vmatpush1.bf16.msra.mxu1 %v2034_v11 }
 0x13e   :  { %433 = vmatprep.subr.bf16.mxu0 %v2036_v12  ;;  %474 = vmatprep.subr.bf16.mxu1 %v2038_v13 }
 0x141   :  { %434 = vmatpush1.bf16.msra.mxu0 %v2044_v14  ;;  %475 = vmatpush1.bf16.msra.mxu1 %v2046_v15 }
 0x142   :  { %435 = vmatprep.subr.bf16.mxu0 %v2048_v16  ;;  %476 = vmatprep.subr.bf16.mxu1 %v2050_v17 }
 0x145   :  { %436 = vmatpush1.bf16.msra.mxu0 %v2056_v18  ;;  %477 = vmatpush1.bf16.msra.mxu1 %v2058_v19 }
 0x146   :  { %437 = vmatprep.subr.bf16.mxu0 %v2060_v20  ;;  %478 = vmatprep.subr.bf16.mxu1 %v2062_v21 }
 0x149   :  { %438 = vmatpush1.bf16.msra.mxu0 %v2068_v22  ;;  %479 = vmatpush1.bf16.msra.mxu1 %v2070_v23 }
 0x14a   :  { %439 = vmatprep.subr.bf16.mxu0 %v2072_v24  ;;  %480 = vmatprep.subr.bf16.mxu1 %v2074_v25 }
 0x14d   :  { %440 = vmatpush1.bf16.msra.mxu0 %v2080_v26  ;;  %481 = vmatpush1.bf16.msra.mxu1 %v2082_v27 }
 0x14e   :  { %568 = vmatprep.subr.bf16.mxu0 %v1990_v59  ;;  %609 = vmatprep.subr.bf16.mxu1 %v1992_v60 }
 0x150   :  { %458 = vmatmul.mubr.bf16.vlgmr.msra.gmra.mrb[4].mxu0 %v1895_v1  ;;  %499 = vmatmul.mubr.bf16.vlgmr.msra.gmra.mrb[4].mxu1 %v1895_v1 }
 0x151   :  { %569 = vmatpush1.bf16.msra.mxu0 %v1994_v61  ;;  %610 = vmatpush1.bf16.msra.mxu1 %v1998_v62 }
 0x152   :  { %570 = vmatprep.subr.bf16.mxu0 %v2000_v63  ;;  %611 = vmatprep.subr.bf16.mxu1 %v2002_v0 }
 0x153   :  { %600 = vmatprep.mubr.bf16.mxu0 %v1895_v1  ;;  %641 = vmatprep.mubr.bf16.mxu1 %v1895_v1 }
 0x155   :  { %571 = vmatpush1.bf16.msra.mxu0 %v2008_v2  ;;  %612 = vmatpush1.bf16.msra.mxu1 %v2010_v3 }
 0x156   :  { %572 = vmatprep.subr.bf16.mxu0 %v2012_v4  ;;  %613 = vmatprep.subr.bf16.mxu1 %v2014_v5 }
 0x159   :  { %573 = vmatpush1.bf16.msra.mxu0 %v2020_v6  ;;  %614 = vmatpush1.bf16.msra.mxu1 %v2022_v7 }
 0x15a   :  { %574 = vmatprep.subr.bf16.mxu0 %v2024_v8  ;;  %615 = vmatprep.subr.bf16.mxu1 %v2026_v9 }
 0x15d   :  { %575 = vmatpush1.bf16.msra.mxu0 %v2032_v10  ;;  %616 = vmatpush1.bf16.msra.mxu1 %v2034_v11 }
 0x15e   :  { %576 = vmatprep.subr.bf16.mxu0 %v2036_v12  ;;  %617 = vmatprep.subr.bf16.mxu1 %v2038_v13 }
 0x161   :  { %577 = vmatpush1.bf16.msra.mxu0 %v2044_v14  ;;  %618 = vmatpush1.bf16.msra.mxu1 %v2046_v15 }
 0x162   :  { %578 = vmatprep.subr.bf16.mxu0 %v2048_v16  ;;  %619 = vmatprep.subr.bf16.mxu1 %v2050_v17 }
 0x165   :  { %579 = vmatpush1.bf16.msra.mxu0 %v2056_v18  ;;  %620 = vmatpush1.bf16.msra.mxu1 %v2058_v19 }
 0x166   :  { %580 = vmatprep.subr.bf16.mxu0 %v2060_v20  ;;  %621 = vmatprep.subr.bf16.mxu1 %v2062_v21 }
 0x169   :  { %581 = vmatpush1.bf16.msra.mxu0 %v2068_v22  ;;  %622 = vmatpush1.bf16.msra.mxu1 %v2070_v23 }
 0x16a   :  { %582 = vmatprep.subr.bf16.mxu0 %v2072_v24  ;;  %623 = vmatprep.subr.bf16.mxu1 %v2074_v25 }
 0x16d   :  { %583 = vmatpush1.bf16.msra.mxu0 %v2080_v26  ;;  %624 = vmatpush1.bf16.msra.mxu1 %v2082_v27 }
 0x16e   :  { %711 = vmatprep.subr.bf16.mxu0 %v1990_v59  ;;  %752 = vmatprep.subr.bf16.mxu1 %v1992_v60 }
 0x223   :  { %v459_v31 = vpop.f32.mrb[4].mxu0  ;;  %v500_v32 = vpop.f32.mrb[4].mxu1 }
 0x224   :  { %v461_v34 = vpop.f32.mrb[5].mxu0  ;;  %v502_v35 = vpop.f32.mrb[5].mxu1 }
 0x225   :  { %v511_v36 = vcombine.low %v459_v31, %v461_v34  ;;  %v512_v38 = vcombine.low %v500_v32, %v502_v35  ;;  %v463_v39 = vpop.f32.mrb[6].mxu0  ;;  %v504_v40 = vpop.f32.mrb[6].mxu1 }
 0x226   :  { %v464_v41 = vpop.f32.mrb[7].mxu0  ;;  %v505_v42 = vpop.f32.mrb[7].mxu1 }
 0x227   :  { %v519_v43 = vrot.slane %v511_v36, %v2125_v33  ;;  %v526_v44 = vrot.slane %v512_v38, %v2125_v33 }
 0x229   :  { %v527_v45 = vcombine.low %v519_v43, %v526_v44 }
 0x22b   :  { %v534_v47 = vrot.slane %v527_v45, %v2125_v33 }
 0x22d   :  { %v536_v48 = vadd.f32 %v534_v47, %v392_v46 }
 0x22f   :  { %v1632_v49 = vmul.f32 -1.442695, %v536_v48 }
 0x231   :  { %1728 = vpow2.f32 %v1632_v49 }
 0x23b   :  { %v1729_v37 = vpop.eup %1728 }
 0x23c   :  { %v540_v50 = vadd.f32 1.0, %v1729_v37 }
 0x23e   :  { %1730 = vrcp.f32 %v540_v50 }
 0x248   :  { %v1731_v51 = vpop.eup %1730 }
 0x249   :  { %v544_v52 = vrot.slane %v1731_v51, 3  ;;  %v548_v54 = vrot.slane %v1731_v51, 1  ;;  %v562_v36 = vrot.slane %v1731_v51, 2 }
 0x24b   :  { %v546_v53 = vmul.f32 2.0, %v544_v52  ;;  %v550_v56 = vmul.f32 0.0, %v548_v54  ;;  %v566_v52 = vld [vmem:[#allocation3 + $0x1] ss:$8 sm:$0xf] }
 0x24d   :  { %v1633_v55 = vadd.f32 -1.0, %v546_v53 }
 0x24f   :  { %v551_v57 = vmul.f32 %v1731_v51, %v1633_v55 }
 0x251   :  { %v2130_v58 = vadd.f32 %v551_v57, %v550_v56 }
 0x253   :  { %v1634_v28 = vmul.f32 -2.0, %v2130_v58 }
 0x255   :  { %v555_v29 = vmul.f32 1.442695, %v1634_v28 }
 0x257   :  { %1732 = vpow2.f32 %v555_v29 }
 0x261   :  { %v1733_v30 = vpop.eup %1732 }
 0x262   :  { %v557_v31 = vadd.f32 1.0, %v1733_v30 }
 0x264   :  { %1734 = vrcp.f32 %v557_v31 }
 0x26e   :  { %v1735_v32 = vpop.eup %1734 }
 0x26f   :  { %v560_v34 = vmul.f32 2.0, %v1735_v32 }
 0x271   :  { %v1635_v35 = vadd.f32 -1.0, %v560_v34 }
 0x273   :  { %v564_v38 = vmul.f32 %v1635_v35, %v562_v36 }
 0x275   :  { %v567_v39 = vpack.c.bf16 %v564_v38, %v564_v38 }
 0x277   :  { %601 = vmatmul.mubr.bf16.vlgmr.msra.gmra.mrb[8].mxu0 %v567_v39  ;;  %642 = vmatmul.mubr.bf16.vlgmr.msra.gmra.mrb[8].mxu1 %v567_v39 }
 0x278   :  { %712 = vmatpush1.bf16.msra.mxu0 %v1994_v61  ;;  %753 = vmatpush1.bf16.msra.mxu1 %v1998_v62 }
 0x279   :  { %713 = vmatprep.subr.bf16.mxu0 %v2000_v63  ;;  %754 = vmatprep.subr.bf16.mxu1 %v2002_v0 }
 0x27a   :  { %743 = vmatprep.mubr.bf16.mxu0 %v1895_v1  ;;  %784 = vmatprep.mubr.bf16.mxu1 %v1895_v1 }
 0x27c   :  { %714 = vmatpush1.bf16.msra.mxu0 %v2008_v2  ;;  %755 = vmatpush1.bf16.msra.mxu1 %v2010_v3 }
 0x27d   :  { %715 = vmatprep.subr.bf16.mxu0 %v2012_v4  ;;  %756 = vmatprep.subr.bf16.mxu1 %v2014_v5 }
 0x280   :  { %716 = vmatpush1.bf16.msra.mxu0 %v2020_v6  ;;  %757 = vmatpush1.bf16.msra.mxu1 %v2022_v7 }
 0x281   :  { %717 = vmatprep.subr.bf16.mxu0 %v2024_v8  ;;  %758 = vmatprep.subr.bf16.mxu1 %v2026_v9 }
 0x284   :  { %718 = vmatpush1.bf16.msra.mxu0 %v2032_v10  ;;  %759 = vmatpush1.bf16.msra.mxu1 %v2034_v11 }
 0x285   :  { %719 = vmatprep.subr.bf16.mxu0 %v2036_v12  ;;  %760 = vmatprep.subr.bf16.mxu1 %v2038_v13 }
 0x288   :  { %720 = vmatpush1.bf16.msra.mxu0 %v2044_v14  ;;  %761 = vmatpush1.bf16.msra.mxu1 %v2046_v15 }
 0x289   :  { %721 = vmatprep.subr.bf16.mxu0 %v2048_v16  ;;  %762 = vmatprep.subr.bf16.mxu1 %v2050_v17 }
 0x28c   :  { %722 = vmatpush1.bf16.msra.mxu0 %v2056_v18  ;;  %763 = vmatpush1.bf16.msra.mxu1 %v2058_v19 }
 0x28d   :  { %723 = vmatprep.subr.bf16.mxu0 %v2060_v20  ;;  %764 = vmatprep.subr.bf16.mxu1 %v2062_v21 }
 0x290   :  { %724 = vmatpush1.bf16.msra.mxu0 %v2068_v22  ;;  %765 = vmatpush1.bf16.msra.mxu1 %v2070_v23 }
 0x291   :  { %725 = vmatprep.subr.bf16.mxu0 %v2072_v24  ;;  %766 = vmatprep.subr.bf16.mxu1 %v2074_v25 }
 0x294   :  { %726 = vmatpush1.bf16.msra.mxu0 %v2080_v26  ;;  %767 = vmatpush1.bf16.msra.mxu1 %v2082_v27 }
 0x295   :  { %854 = vmatprep.subr.bf16.mxu0 %v1990_v59  ;;  %895 = vmatprep.subr.bf16.mxu1 %v1992_v60 }
 0x34a   :  { %v602_v40 = vpop.f32.mrb[8].mxu0  ;;  %v643_v41 = vpop.f32.mrb[8].mxu1 }
 0x34b   :  { %v604_v42 = vpop.f32.mrb[9].mxu0  ;;  %v645_v43 = vpop.f32.mrb[9].mxu1 }
 0x34c   :  { %v654_v44 = vcombine.low %v602_v40, %v604_v42  ;;  %v655_v45 = vcombine.low %v643_v41, %v645_v43  ;;  %v606_v46 = vpop.f32.mrb[10].mxu0  ;;  %v647_v47 = vpop.f32.mrb[10].mxu1 }
 0x34d   :  { %v607_v48 = vpop.f32.mrb[11].mxu0  ;;  %v648_v49 = vpop.f32.mrb[11].mxu1 }
 0x34e   :  { %v662_v37 = vrot.slane %v654_v44, %v2125_v33  ;;  %v669_v50 = vrot.slane %v655_v45, %v2125_v33 }
 0x350   :  { %v670_v51 = vcombine.low %v662_v37, %v669_v50 }
 0x352   :  { %v677_v53 = vrot.slane %v670_v51, %v2125_v33 }
 0x354   :  { %v679_v54 = vadd.f32 %v677_v53, %v566_v52 }
 0x356   :  { %v1636_v55 = vmul.f32 -1.442695, %v679_v54 }
 0x358   :  { %1736 = vpow2.f32 %v1636_v55 }
 0x362   :  { %v1737_v56 = vpop.eup %1736 }
 0x363   :  { %v683_v57 = vadd.f32 1.0, %v1737_v56 }
 0x365   :  { %1738 = vrcp.f32 %v683_v57 }
 0x36f   :  { %v1739_v28 = vpop.eup %1738 }
 0x370   :  { %v687_v29 = vrot.slane %v1739_v28, 3  ;;  %v691_v31 = vrot.slane %v1739_v28, 1  ;;  %v705_v45 = vrot.slane %v1739_v28, 2 }
 0x372   :  { %v689_v30 = vmul.f32 2.0, %v687_v29  ;;  %v693_v34 = vmul.f32 %v691_v31, %v2130_v58  ;;  %v709_v29 = vld [vmem:[#allocation3 + $0x2] ss:$8 sm:$0xf] }
 0x374   :  { %v1637_v32 = vadd.f32 -1.0, %v689_v30 }
 0x376   :  { %v694_v35 = vmul.f32 %v1739_v28, %v1637_v32 }
 0x378   :  { %v2171_v36 = vadd.f32 %v694_v35, %v693_v34 }
 0x37a   :  { %v1638_v38 = vmul.f32 -2.0, %v2171_v36 }
 0x37c   :  { %v698_v39 = vmul.f32 1.442695, %v1638_v38 }
 0x37e   :  { %1740 = vpow2.f32 %v698_v39 }
 0x388   :  { %v1741_v40 = vpop.eup %1740 }
 0x389   :  { %v700_v41 = vadd.f32 1.0, %v1741_v40 }
 0x38b   :  { %1742 = vrcp.f32 %v700_v41 }
 0x395   :  { %v1743_v42 = vpop.eup %1742 }
 0x396   :  { %v703_v43 = vmul.f32 2.0, %v1743_v42 }
 0x398   :  { %v1639_v44 = vadd.f32 -1.0, %v703_v43 }
 0x39a   :  { %v707_v46 = vmul.f32 %v1639_v44, %v705_v45 }
 0x39c   :  { %v710_v47 = vpack.c.bf16 %v707_v46, %v707_v46 }
 0x39e   :  { %744 = vmatmul.mubr.bf16.vlgmr.msra.gmra.mrb[12].mxu0 %v710_v47  ;;  %785 = vmatmul.mubr.bf16.vlgmr.msra.gmra.mrb[12].mxu1 %v710_v47 }
 0x39f   :  { %855 = vmatpush1.bf16.msra.mxu0 %v1994_v61  ;;  %896 = vmatpush1.bf16.msra.mxu1 %v1998_v62 }
 0x3a0   :  { %856 = vmatprep.subr.bf16.mxu0 %v2000_v63  ;;  %897 = vmatprep.subr.bf16.mxu1 %v2002_v0 }
 0x3a1   :  { %886 = vmatprep.mubr.bf16.mxu0 %v1895_v1  ;;  %927 = vmatprep.mubr.bf16.mxu1 %v1895_v1 }
 0x3a3   :  { %857 = vmatpush1.bf16.msra.mxu0 %v2008_v2  ;;  %898 = vmatpush1.bf16.msra.mxu1 %v2010_v3 }
 0x3a4   :  { %858 = vmatprep.subr.bf16.mxu0 %v2012_v4  ;;  %899 = vmatprep.subr.bf16.mxu1 %v2014_v5 }
 0x3a7   :  { %859 = vmatpush1.bf16.msra.mxu0 %v2020_v6  ;;  %900 = vmatpush1.bf16.msra.mxu1 %v2022_v7 }
 0x3a8   :  { %860 = vmatprep.subr.bf16.mxu0 %v2024_v8  ;;  %901 = vmatprep.subr.bf16.mxu1 %v2026_v9 }
 0x3ab   :  { %861 = vmatpush1.bf16.msra.mxu0 %v2032_v10  ;;  %902 = vmatpush1.bf16.msra.mxu1 %v2034_v11 }
 0x3ac   :  { %862 = vmatprep.subr.bf16.mxu0 %v2036_v12  ;;  %903 = vmatprep.subr.bf16.mxu1 %v2038_v13 }
 0x3af   :  { %863 = vmatpush1.bf16.msra.mxu0 %v2044_v14  ;;  %904 = vmatpush1.bf16.msra.mxu1 %v2046_v15 }
 0x3b0   :  { %864 = vmatprep.subr.bf16.mxu0 %v2048_v16  ;;  %905 = vmatprep.subr.bf16.mxu1 %v2050_v17 }
 0x3b3   :  { %865 = vmatpush1.bf16.msra.mxu0 %v2056_v18  ;;  %906 = vmatpush1.bf16.msra.mxu1 %v2058_v19 }
 0x3b4   :  { %866 = vmatprep.subr.bf16.mxu0 %v2060_v20  ;;  %907 = vmatprep.subr.bf16.mxu1 %v2062_v21 }
 0x3b7   :  { %867 = vmatpush1.bf16.msra.mxu0 %v2068_v22  ;;  %908 = vmatpush1.bf16.msra.mxu1 %v2070_v23 }
 0x3b8   :  { %868 = vmatprep.subr.bf16.mxu0 %v2072_v24  ;;  %909 = vmatprep.subr.bf16.mxu1 %v2074_v25 }
 0x3bb   :  { %869 = vmatpush1.bf16.msra.mxu0 %v2080_v26  ;;  %910 = vmatpush1.bf16.msra.mxu1 %v2082_v27 }
 0x3bc   :  { %997 = vmatprep.subr.bf16.mxu0 %v1990_v59  ;;  %1038 = vmatprep.subr.bf16.mxu1 %v1992_v60 }
 0x471   :  { %v745_v58 = vpop.f32.mrb[12].mxu0  ;;  %v786_v48 = vpop.f32.mrb[12].mxu1 }
 0x472   :  { %v747_v49 = vpop.f32.mrb[13].mxu0  ;;  %v788_v37 = vpop.f32.mrb[13].mxu1 }
 0x473   :  { %v797_v50 = vcombine.low %v745_v58, %v747_v49  ;;  %v798_v51 = vcombine.low %v786_v48, %v788_v37  ;;  %v749_v52 = vpop.f32.mrb[14].mxu0  ;;  %v790_v53 = vpop.f32.mrb[14].mxu1 }
 0x474   :  { %v750_v54 = vpop.f32.mrb[15].mxu0  ;;  %v791_v55 = vpop.f32.mrb[15].mxu1 }
 0x475   :  { %v805_v56 = vrot.slane %v797_v50, %v2125_v33  ;;  %v812_v57 = vrot.slane %v798_v51, %v2125_v33 }
 0x477   :  { %v813_v28 = vcombine.low %v805_v56, %v812_v57 }
 0x479   :  { %v820_v30 = vrot.slane %v813_v28, %v2125_v33 }
 0x47b   :  { %v822_v31 = vadd.f32 %v820_v30, %v709_v29 }
 0x47d   :  { %v1640_v32 = vmul.f32 -1.442695, %v822_v31 }
 0x47f   :  { %1744 = vpow2.f32 %v1640_v32 }
 0x489   :  { %v1745_v34 = vpop.eup %1744 }
 0x48a   :  { %v826_v35 = vadd.f32 1.0, %v1745_v34 }
 0x48c   :  { %1746 = vrcp.f32 %v826_v35 }
 0x496   :  { %v1747_v38 = vpop.eup %1746 }
 0x497   :  { %v830_v39 = vrot.slane %v1747_v38, 3  ;;  %v834_v41 = vrot.slane %v1747_v38, 1  ;;  %v848_v51 = vrot.slane %v1747_v38, 2 }
 0x499   :  { %v832_v40 = vmul.f32 2.0, %v830_v39  ;;  %v836_v43 = vmul.f32 %v834_v41, %v2171_v36  ;;  %v852_v39 = vld [vmem:[#allocation3 + $0x3] ss:$8 sm:$0xf] }
 0x49b   :  { %v1641_v42 = vadd.f32 -1.0, %v832_v40 }
 0x49d   :  { %v837_v44 = vmul.f32 %v1747_v38, %v1641_v42 }
 0x49f   :  { %v2212_v45 = vadd.f32 %v837_v44, %v836_v43 }
 0x4a1   :  { %v1642_v46 = vmul.f32 -2.0, %v2212_v45 }
 0x4a3   :  { %v841_v47 = vmul.f32 1.442695, %v1642_v46 }
 0x4a5   :  { %1748 = vpow2.f32 %v841_v47 }
 0x4af   :  { %v1749_v58 = vpop.eup %1748 }
 0x4b0   :  { %v843_v48 = vadd.f32 1.0, %v1749_v58 }
 0x4b2   :  { %1750 = vrcp.f32 %v843_v48 }
 0x4bc   :  { %v1751_v49 = vpop.eup %1750 }
 0x4bd   :  { %v846_v37 = vmul.f32 2.0, %v1751_v49 }
 0x4bf   :  { %v1643_v50 = vadd.f32 -1.0, %v846_v37 }
 0x4c1   :  { %v850_v52 = vmul.f32 %v1643_v50, %v848_v51 }
 0x4c3   :  { %v853_v53 = vpack.c.bf16 %v850_v52, %v850_v52 }
 0x4c5   :  { %887 = vmatmul.mubr.bf16.vlgmr.msra.gmra.mrb[16].mxu0 %v853_v53  ;;  %928 = vmatmul.mubr.bf16.vlgmr.msra.gmra.mrb[16].mxu1 %v853_v53 }
 0x4c6   :  { %998 = vmatpush1.bf16.msra.mxu0 %v1994_v61  ;;  %1039 = vmatpush1.bf16.msra.mxu1 %v1998_v62 }
 0x4c7   :  { %999 = vmatprep.subr.bf16.mxu0 %v2000_v63  ;;  %1040 = vmatprep.subr.bf16.mxu1 %v2002_v0 }
 0x4c8   :  { %1029 = vmatprep.mubr.bf16.mxu0 %v1895_v1  ;;  %1070 = vmatprep.mubr.bf16.mxu1 %v1895_v1 }
 0x4ca   :  { %1000 = vmatpush1.bf16.msra.mxu0 %v2008_v2  ;;  %1041 = vmatpush1.bf16.msra.mxu1 %v2010_v3 }
 0x4cb   :  { %1001 = vmatprep.subr.bf16.mxu0 %v2012_v4  ;;  %1042 = vmatprep.subr.bf16.mxu1 %v2014_v5 }
 0x4ce   :  { %1002 = vmatpush1.bf16.msra.mxu0 %v2020_v6  ;;  %1043 = vmatpush1.bf16.msra.mxu1 %v2022_v7 }
 0x4cf   :  { %1003 = vmatprep.subr.bf16.mxu0 %v2024_v8  ;;  %1044 = vmatprep.subr.bf16.mxu1 %v2026_v9 }
 0x4d2   :  { %1004 = vmatpush1.bf16.msra.mxu0 %v2032_v10  ;;  %1045 = vmatpush1.bf16.msra.mxu1 %v2034_v11 }
 0x4d3   :  { %1005 = vmatprep.subr.bf16.mxu0 %v2036_v12  ;;  %1046 = vmatprep.subr.bf16.mxu1 %v2038_v13 }
 0x4d6   :  { %1006 = vmatpush1.bf16.msra.mxu0 %v2044_v14  ;;  %1047 = vmatpush1.bf16.msra.mxu1 %v2046_v15 }
 0x4d7   :  { %1007 = vmatprep.subr.bf16.mxu0 %v2048_v16  ;;  %1048 = vmatprep.subr.bf16.mxu1 %v2050_v17 }
 0x4da   :  { %1008 = vmatpush1.bf16.msra.mxu0 %v2056_v18  ;;  %1049 = vmatpush1.bf16.msra.mxu1 %v2058_v19 }
 0x4db   :  { %1009 = vmatprep.subr.bf16.mxu0 %v2060_v20  ;;  %1050 = vmatprep.subr.bf16.mxu1 %v2062_v21 }
 0x4de   :  { %1010 = vmatpush1.bf16.msra.mxu0 %v2068_v22  ;;  %1051 = vmatpush1.bf16.msra.mxu1 %v2070_v23 }
 0x4df   :  { %1011 = vmatprep.subr.bf16.mxu0 %v2072_v24  ;;  %1052 = vmatprep.subr.bf16.mxu1 %v2074_v25 }
 0x4e2   :  { %1012 = vmatpush1.bf16.msra.mxu0 %v2080_v26  ;;  %1053 = vmatpush1.bf16.msra.mxu1 %v2082_v27 }
 0x4e3   :  { %1140 = vmatprep.subr.bf16.mxu0 %v1990_v59  ;;  %1181 = vmatprep.subr.bf16.mxu1 %v1992_v60 }
 0x598   :  { %v888_v36 = vpop.f32.mrb[16].mxu0  ;;  %v929_v54 = vpop.f32.mrb[16].mxu1 }
 0x599   :  { %v890_v55 = vpop.f32.mrb[17].mxu0  ;;  %v931_v56 = vpop.f32.mrb[17].mxu1 }
 0x59a   :  { %v940_v57 = vcombine.low %v888_v36, %v890_v55  ;;  %v941_v28 = vcombine.low %v929_v54, %v931_v56  ;;  %v892_v29 = vpop.f32.mrb[18].mxu0  ;;  %v933_v30 = vpop.f32.mrb[18].mxu1 }
 0x59b   :  { %v893_v31 = vpop.f32.mrb[19].mxu0  ;;  %v934_v32 = vpop.f32.mrb[19].mxu1 }
 0x59c   :  { %v948_v34 = vrot.slane %v940_v57, %v2125_v33  ;;  %v955_v35 = vrot.slane %v941_v28, %v2125_v33 }
 0x59e   :  { %v956_v38 = vcombine.low %v948_v34, %v955_v35 }
 0x5a0   :  { %v963_v40 = vrot.slane %v956_v38, %v2125_v33 }
 0x5a2   :  { %v965_v41 = vadd.f32 %v963_v40, %v852_v39 }
 0x5a4   :  { %v1644_v42 = vmul.f32 -1.442695, %v965_v41 }
 0x5a6   :  { %1752 = vpow2.f32 %v1644_v42 }
 0x5b0   :  { %v1753_v43 = vpop.eup %1752 }
 0x5b1   :  { %v969_v44 = vadd.f32 1.0, %v1753_v43 }
 0x5b3   :  { %1754 = vrcp.f32 %v969_v44 }
 0x5bd   :  { %v1755_v46 = vpop.eup %1754 }
 0x5be   :  { %v973_v47 = vrot.slane %v1755_v46, 3  ;;  %v977_v48 = vrot.slane %v1755_v46, 1  ;;  %v991_v28 = vrot.slane %v1755_v46, 2 }
 0x5c0   :  { %v975_v58 = vmul.f32 2.0, %v973_v47  ;;  %v979_v37 = vmul.f32 %v977_v48, %v2212_v45  ;;  %v995_v47 = vld [vmem:[#allocation3 + $0x4] ss:$8 sm:$0xf] }
 0x5c2   :  { %v1645_v49 = vadd.f32 -1.0, %v975_v58 }
 0x5c4   :  { %v980_v50 = vmul.f32 %v1755_v46, %v1645_v49 }
 0x5c6   :  { %v2253_v51 = vadd.f32 %v980_v50, %v979_v37 }
 0x5c8   :  { %v1646_v52 = vmul.f32 -2.0, %v2253_v51 }
 0x5ca   :  { %v984_v53 = vmul.f32 1.442695, %v1646_v52 }
 0x5cc   :  { %1756 = vpow2.f32 %v984_v53 }
 0x5d6   :  { %v1757_v36 = vpop.eup %1756 }
 0x5d7   :  { %v986_v54 = vadd.f32 1.0, %v1757_v36 }
 0x5d9   :  { %1758 = vrcp.f32 %v986_v54 }
 0x5e3   :  { %v1759_v55 = vpop.eup %1758 }
 0x5e4   :  { %v989_v56 = vmul.f32 2.0, %v1759_v55 }
 0x5e6   :  { %v1647_v57 = vadd.f32 -1.0, %v989_v56 }
 0x5e8   :  { %v993_v29 = vmul.f32 %v1647_v57, %v991_v28 }
 0x5ea   :  { %v996_v30 = vpack.c.bf16 %v993_v29, %v993_v29 }
 0x5ec   :  { %1030 = vmatmul.mubr.bf16.vlgmr.msra.gmra.mrb[20].mxu0 %v996_v30  ;;  %1071 = vmatmul.mubr.bf16.vlgmr.msra.gmra.mrb[20].mxu1 %v996_v30 }
 0x5ed   :  { %1141 = vmatpush1.bf16.msra.mxu0 %v1994_v61  ;;  %1182 = vmatpush1.bf16.msra.mxu1 %v1998_v62 }
 0x5ee   :  { %1142 = vmatprep.subr.bf16.mxu0 %v2000_v63  ;;  %1183 = vmatprep.subr.bf16.mxu1 %v2002_v0 }
 0x5ef   :  { %1172 = vmatprep.mubr.bf16.mxu0 %v1895_v1  ;;  %1213 = vmatprep.mubr.bf16.mxu1 %v1895_v1 }
 0x5f1   :  { %1143 = vmatpush1.bf16.msra.mxu0 %v2008_v2  ;;  %1184 = vmatpush1.bf16.msra.mxu1 %v2010_v3 }
 0x5f2   :  { %1144 = vmatprep.subr.bf16.mxu0 %v2012_v4  ;;  %1185 = vmatprep.subr.bf16.mxu1 %v2014_v5 }
 0x5f5   :  { %1145 = vmatpush1.bf16.msra.mxu0 %v2020_v6  ;;  %1186 = vmatpush1.bf16.msra.mxu1 %v2022_v7 }
 0x5f6   :  { %1146 = vmatprep.subr.bf16.mxu0 %v2024_v8  ;;  %1187 = vmatprep.subr.bf16.mxu1 %v2026_v9 }
 0x5f9   :  { %1147 = vmatpush1.bf16.msra.mxu0 %v2032_v10  ;;  %1188 = vmatpush1.bf16.msra.mxu1 %v2034_v11 }
 0x5fa   :  { %1148 = vmatprep.subr.bf16.mxu0 %v2036_v12  ;;  %1189 = vmatprep.subr.bf16.mxu1 %v2038_v13 }
 0x5fd   :  { %1149 = vmatpush1.bf16.msra.mxu0 %v2044_v14  ;;  %1190 = vmatpush1.bf16.msra.mxu1 %v2046_v15 }
 0x5fe   :  { %1150 = vmatprep.subr.bf16.mxu0 %v2048_v16  ;;  %1191 = vmatprep.subr.bf16.mxu1 %v2050_v17 }
 0x601   :  { %1151 = vmatpush1.bf16.msra.mxu0 %v2056_v18  ;;  %1192 = vmatpush1.bf16.msra.mxu1 %v2058_v19 }
 0x602   :  { %1152 = vmatprep.subr.bf16.mxu0 %v2060_v20  ;;  %1193 = vmatprep.subr.bf16.mxu1 %v2062_v21 }
 0x605   :  { %1153 = vmatpush1.bf16.msra.mxu0 %v2068_v22  ;;  %1194 = vmatpush1.bf16.msra.mxu1 %v2070_v23 }
 0x606   :  { %1154 = vmatprep.subr.bf16.mxu0 %v2072_v24  ;;  %1195 = vmatprep.subr.bf16.mxu1 %v2074_v25 }
 0x609   :  { %1155 = vmatpush1.bf16.msra.mxu0 %v2080_v26  ;;  %1196 = vmatpush1.bf16.msra.mxu1 %v2082_v27 }
 0x60a   :  { %1283 = vmatprep.subr.bf16.mxu0 %v1990_v59  ;;  %1324 = vmatprep.subr.bf16.mxu1 %v1992_v60 }
 0x6bf   :  { %v1031_v45 = vpop.f32.mrb[20].mxu0  ;;  %v1072_v31 = vpop.f32.mrb[20].mxu1 }
 0x6c0   :  { %v1033_v32 = vpop.f32.mrb[21].mxu0  ;;  %v1074_v34 = vpop.f32.mrb[21].mxu1 }
 0x6c1   :  { %v1083_v35 = vcombine.low %v1031_v45, %v1033_v32  ;;  %v1084_v38 = vcombine.low %v1072_v31, %v1074_v34  ;;  %v1035_v39 = vpop.f32.mrb[22].mxu0  ;;  %v1076_v40 = vpop.f32.mrb[22].mxu1 }
 0x6c2   :  { %v1036_v41 = vpop.f32.mrb[23].mxu0  ;;  %v1077_v42 = vpop.f32.mrb[23].mxu1 }
 0x6c3   :  { %v1091_v43 = vrot.slane %v1083_v35, %v2125_v33  ;;  %v1098_v44 = vrot.slane %v1084_v38, %v2125_v33 }
 0x6c5   :  { %v1099_v46 = vcombine.low %v1091_v43, %v1098_v44 }
 0x6c7   :  { %v1106_v58 = vrot.slane %v1099_v46, %v2125_v33 }
 0x6c9   :  { %v1108_v48 = vadd.f32 %v1106_v58, %v995_v47 }
 0x6cb   :  { %v1648_v49 = vmul.f32 -1.442695, %v1108_v48 }
 0x6cd   :  { %1760 = vpow2.f32 %v1648_v49 }
 0x6d7   :  { %v1761_v37 = vpop.eup %1760 }
 0x6d8   :  { %v1112_v50 = vadd.f32 1.0, %v1761_v37 }
 0x6da   :  { %1762 = vrcp.f32 %v1112_v50  ;;  %v1792_v50 = vld [vmem:[#allocation2] sm:$0xff] }
 0x6e4   :  { %v1763_v52 = vpop.eup %1762 }
 0x6e5   :  { %v1116_v53 = vrot.slane %v1763_v52, 3  ;;  %v1120_v54 = vrot.slane %v1763_v52, 1  ;;  %v1134_v38 = vrot.slane %v1763_v52, 2 }
 0x6e7   :  { %v1118_v36 = vmul.f32 2.0, %v1116_v53  ;;  %v1122_v56 = vmul.f32 %v1120_v54, %v2253_v51  ;;  %v1794_v53 = vld [vmem:[#allocation2 + $0x28] sm:$0xff]  ;;  %v1796_v54 = vld [vmem:[#allocation2 + $0x20] sm:$0xff] }
 0x6e9   :  { %v1649_v55 = vadd.f32 -1.0, %v1118_v36  ;;  %v1795_v36 = vld [vmem:[#allocation2 + $0x38] sm:$0xff] }
 0x6eb   :  { %v1123_v57 = vmul.f32 %v1763_v52, %v1649_v55  ;;  %v1793_v52 = vld [vmem:[#allocation2 + $0x10] sm:$0xff] }
 0x6ec   :  { %v1797_v55 = vld [vmem:[#allocation2 + $0x30] sm:$0xff] }
 0x6ed   :  { %v2294_v28 = vadd.f32 %v1123_v57, %v1122_v56  ;;  %v1798_v56 = vld [vmem:[#allocation2 + $0x48] sm:$0xff]  ;;  %v1799_v57 = vld [vmem:[#allocation2 + $0x58] sm:$0xff] }
 0x6ef   :  { %v1650_v29 = vmul.f32 -2.0, %v2294_v28 }
 0x6f1   :  { %v1127_v30 = vmul.f32 1.442695, %v1650_v29  ;;  %v1801_v29 = vld [vmem:[#allocation2 + $0x50] sm:$0xff] }
 0x6f3   :  { %1764 = vpow2.f32 %v1127_v30  ;;  %v1802_v30 = vld [vmem:[#allocation2 + $0x68] sm:$0xff] }
 0x6fd   :  { %v1765_v45 = vpop.eup %1764 }
 0x6fe   :  { %v1129_v31 = vadd.f32 1.0, %v1765_v45  ;;  %v1803_v45 = vld [vmem:[#allocation2 + $0x78] sm:$0xff] }
 0x700   :  { %1766 = vrcp.f32 %v1129_v31  ;;  %v1804_v31 = vld [vmem:[#allocation2 + $0x60] sm:$0xff] }
 0x70a   :  { %v1767_v32 = vpop.eup %1766 }
 0x70b   :  { %v1132_v34 = vmul.f32 2.0, %v1767_v32  ;;  %v1805_v32 = vld [vmem:[#allocation2 + $0x70] sm:$0xff] }
 0x70d   :  { %v1651_v35 = vadd.f32 -1.0, %v1132_v34  ;;  %v1807_v34 = vld [vmem:[#allocation2 + $0x98] sm:$0xff] }
 0x70f   :  { %v1136_v39 = vmul.f32 %v1651_v35, %v1134_v38  ;;  %v1808_v35 = vld [vmem:[#allocation2 + $0x80] sm:$0xff]  ;;  %v1809_v38 = vld [vmem:[#allocation2 + $0x90] sm:$0xff] }
 0x711   :  { %v1139_v40 = vpack.c.bf16 %v1136_v39, %v1136_v39  ;;  %v1810_v39 = vld [vmem:[#allocation2 + $0xa8] sm:$0xff] }
 0x713   :  { %1173 = vmatmul.mubr.bf16.vlgmr.msra.gmra.mrb[24].mxu0 %v1139_v40  ;;  %1214 = vmatmul.mubr.bf16.vlgmr.msra.gmra.mrb[24].mxu1 %v1139_v40  ;;  %v1811_v40 = vld [vmem:[#allocation2 + $0xb8] sm:$0xff] }
 0x714   :  { %1284 = vmatpush1.bf16.msra.mxu0 %v1994_v61  ;;  %1325 = vmatpush1.bf16.msra.mxu1 %v1998_v62 }
 0x715   :  { %1285 = vmatprep.subr.bf16.mxu0 %v2000_v63  ;;  %1326 = vmatprep.subr.bf16.mxu1 %v2002_v0 }
 0x716   :  { %1315 = vmatprep.mubr.bf16.mxu0 %v1895_v1  ;;  %1356 = vmatprep.mubr.bf16.mxu1 %v1895_v1 }
 0x718   :  { %1286 = vmatpush1.bf16.msra.mxu0 %v2008_v2  ;;  %1327 = vmatpush1.bf16.msra.mxu1 %v2010_v3 }
 0x719   :  { %1287 = vmatprep.subr.bf16.mxu0 %v2012_v4  ;;  %1328 = vmatprep.subr.bf16.mxu1 %v2014_v5 }
 0x71c   :  { %1288 = vmatpush1.bf16.msra.mxu0 %v2020_v6  ;;  %1329 = vmatpush1.bf16.msra.mxu1 %v2022_v7 }
 0x71d   :  { %1289 = vmatprep.subr.bf16.mxu0 %v2024_v8  ;;  %1330 = vmatprep.subr.bf16.mxu1 %v2026_v9 }
 0x720   :  { %1290 = vmatpush1.bf16.msra.mxu0 %v2032_v10  ;;  %1331 = vmatpush1.bf16.msra.mxu1 %v2034_v11  ;;  %v1138_v11 = vld [vmem:[#allocation3 + $0x5] ss:$8 sm:$0xf] }
 0x721   :  { %1291 = vmatprep.subr.bf16.mxu0 %v2036_v12  ;;  %1332 = vmatprep.subr.bf16.mxu1 %v2038_v13 }
 0x724   :  { %1292 = vmatpush1.bf16.msra.mxu0 %v2044_v14  ;;  %1333 = vmatpush1.bf16.msra.mxu1 %v2046_v15 }
 0x725   :  { %1293 = vmatprep.subr.bf16.mxu0 %v2048_v16  ;;  %1334 = vmatprep.subr.bf16.mxu1 %v2050_v17 }
 0x728   :  { %1294 = vmatpush1.bf16.msra.mxu0 %v2056_v18  ;;  %1335 = vmatpush1.bf16.msra.mxu1 %v2058_v19 }
 0x729   :  { %1295 = vmatprep.subr.bf16.mxu0 %v2060_v20  ;;  %1336 = vmatprep.subr.bf16.mxu1 %v2062_v21 }
 0x72c   :  { %1296 = vmatpush1.bf16.msra.mxu0 %v2068_v22  ;;  %1337 = vmatpush1.bf16.msra.mxu1 %v2070_v23 }
 0x72d   :  { %1297 = vmatprep.subr.bf16.mxu0 %v2072_v24  ;;  %1338 = vmatprep.subr.bf16.mxu1 %v2074_v25 }
 0x730   :  { %1298 = vmatpush1.bf16.msra.mxu0 %v2080_v26  ;;  %1339 = vmatpush1.bf16.msra.mxu1 %v2082_v27 }
 0x731   :  { %1426 = vmatprep.subr.bf16.mxu0 %v1990_v59  ;;  %1467 = vmatprep.subr.bf16.mxu1 %v1992_v60 }
 0x7e6   :  { %v1174_v61 = vpop.f32.mrb[24].mxu0  ;;  %v1215_v62 = vpop.f32.mrb[24].mxu1 }
 0x7e7   :  { %v1176_v63 = vpop.f32.mrb[25].mxu0  ;;  %v1217_v0 = vpop.f32.mrb[25].mxu1 }
 0x7e8   :  { %v1226_v2 = vcombine.low %v1174_v61, %v1176_v63  ;;  %v1227_v3 = vcombine.low %v1215_v62, %v1217_v0  ;;  %v1178_v4 = vpop.f32.mrb[26].mxu0  ;;  %v1219_v5 = vpop.f32.mrb[26].mxu1  ;;  %v1812_v61 = vld [vmem:[#allocation2 + $0xa0] sm:$0xff]  ;;  %v1813_v62 = vld [vmem:[#allocation2 + $0xb0] sm:$0xff]  ;;  %v1814_v63 = vld [vmem:[#allocation2 + $0xc8] sm:$0xff] }
 0x7e9   :  { %v1179_v6 = vpop.f32.mrb[27].mxu0  ;;  %v1220_v7 = vpop.f32.mrb[27].mxu1  ;;  %v1815_v0 = vld [vmem:[#allocation2 + $0xd8] sm:$0xff] }
 0x7ea   :  { %v1234_v8 = vrot.slane %v1226_v2, %v2125_v33  ;;  %v1241_v9 = vrot.slane %v1227_v3, %v2125_v33 }
 0x7ec   :  { %v1242_v10 = vcombine.low %v1234_v8, %v1241_v9 }
 0x7ee   :  { %v1249_v59 = vrot.slane %v1242_v10, %v2125_v33 }
 0x7f0   :  { %v1251_v12 = vadd.f32 %v1249_v59, %v1138_v11 }
 0x7f2   :  { %v1652_v60 = vmul.f32 -1.442695, %v1251_v12 }
 0x7f4   :  { %1768 = vpow2.f32 %v1652_v60 }
 0x7fe   :  { %v1769_v13 = vpop.eup %1768 }
 0x7ff   :  { %v1255_v14 = vadd.f32 1.0, %v1769_v13 }
 0x801   :  { %1770 = vrcp.f32 %v1255_v14 }
 0x80b   :  { %v1771_v15 = vpop.eup %1770 }
 0x80c   :  { %v1259_v16 = vrot.slane %v1771_v15, 3  ;;  %v1263_v18 = vrot.slane %v1771_v15, 1  ;;  %v1277_v48 = vrot.slane %v1771_v15, 2 }
 0x80e   :  { %v1261_v17 = vmul.f32 2.0, %v1259_v16  ;;  %v1265_v20 = vmul.f32 %v1263_v18, %v2294_v28  ;;  %v1800_v28 = vld [vmem:[#allocation2 + $0x40] sm:$0xff] }
 0x810   :  { %v1653_v19 = vadd.f32 -1.0, %v1261_v17 }
 0x812   :  { %v1266_v21 = vmul.f32 %v1771_v15, %v1653_v19 }
 0x814   :  { %v2335_v51 = vadd.f32 %v1266_v21, %v1265_v20 }
 0x816   :  { %v1654_v41 = vmul.f32 -2.0, %v2335_v51 }
 0x818   :  { %v1270_v42 = vmul.f32 1.442695, %v1654_v41 }
 0x81a   :  { %1772 = vpow2.f32 %v1270_v42 }
 0x824   :  { %v1773_v43 = vpop.eup %1772 }
 0x825   :  { %v1272_v44 = vadd.f32 1.0, %v1773_v43 }
 0x827   :  { %1774 = vrcp.f32 %v1272_v44 }
 0x831   :  { %v1775_v46 = vpop.eup %1774 }
 0x832   :  { %v1275_v47 = vmul.f32 2.0, %v1775_v46 }
 0x834   :  { %v1655_v58 = vadd.f32 -1.0, %v1275_v47 }
 0x836   :  { %v1279_v49 = vmul.f32 %v1655_v58, %v1277_v48 }
 0x838   :  { %v1282_v37 = vpack.c.bf16 %v1279_v49, %v1279_v49 }
 0x83a   :  { %1316 = vmatmul.mubr.bf16.vlgmr.msra.gmra.mrb[28].mxu0 %v1282_v37  ;;  %1357 = vmatmul.mubr.bf16.vlgmr.msra.gmra.mrb[28].mxu1 %v1282_v37 }
 0x83b   :  { %1427 = vmatpush1.bf16.msra.mxu0 %v1792_v50  ;;  %1468 = vmatpush1.bf16.msra.mxu1 %v1793_v52 }
 0x83c   :  { %1428 = vmatprep.subr.bf16.mxu0 %v1794_v53  ;;  %1469 = vmatprep.subr.bf16.mxu1 %v1795_v36 }
 0x83d   :  { %1458 = vmatprep.mubr.bf16.mxu0 %v1895_v1  ;;  %1499 = vmatprep.mubr.bf16.mxu1 %v1895_v1  ;;  %v1806_v1 = vld [vmem:[#allocation2 + $0x88] sm:$0xff] }
 0x83f   :  { %1429 = vmatpush1.bf16.msra.mxu0 %v1796_v54  ;;  %1470 = vmatpush1.bf16.msra.mxu1 %v1797_v55 }
 0x840   :  { %1430 = vmatprep.subr.bf16.mxu0 %v1798_v56  ;;  %1471 = vmatprep.subr.bf16.mxu1 %v1799_v57 }
 0x843   :  { %1431 = vmatpush1.bf16.msra.mxu0 %v1800_v28  ;;  %1472 = vmatpush1.bf16.msra.mxu1 %v1801_v29 }
 0x844   :  { %1432 = vmatprep.subr.bf16.mxu0 %v1802_v30  ;;  %1473 = vmatprep.subr.bf16.mxu1 %v1803_v45  ;;  %v1424_v45 = vld [vmem:[#allocation3 + $0x7] ss:$8 sm:$0xf] }
 0x847   :  { %1433 = vmatpush1.bf16.msra.mxu0 %v1804_v31  ;;  %1474 = vmatpush1.bf16.msra.mxu1 %v1805_v32 }
 0x848   :  { %1434 = vmatprep.subr.bf16.mxu0 %v1806_v1  ;;  %1475 = vmatprep.subr.bf16.mxu1 %v1807_v34 }
 0x84b   :  { %1435 = vmatpush1.bf16.msra.mxu0 %v1808_v35  ;;  %1476 = vmatpush1.bf16.msra.mxu1 %v1809_v38 }
 0x84c   :  { %1436 = vmatprep.subr.bf16.mxu0 %v1810_v39  ;;  %1477 = vmatprep.subr.bf16.mxu1 %v1811_v40 }
 0x84f   :  { %1437 = vmatpush1.bf16.msra.mxu0 %v1812_v61  ;;  %1478 = vmatpush1.bf16.msra.mxu1 %v1813_v62 }
 0x850   :  { %1438 = vmatprep.subr.bf16.mxu0 %v1814_v63  ;;  %1479 = vmatprep.subr.bf16.mxu1 %v1815_v0 }
 0x853   :  { %1439 = vmatpush1.bf16.msra.mxu0 %v2068_v22  ;;  %1480 = vmatpush1.bf16.msra.mxu1 %v2070_v23 }
 0x854   :  { %1440 = vmatprep.subr.bf16.mxu0 %v2072_v24  ;;  %1481 = vmatprep.subr.bf16.mxu1 %v2074_v25  ;;  %v1281_v25 = vld [vmem:[#allocation3 + $0x6] ss:$8 sm:$0xf] }
 0x857   :  { %1441 = vmatpush1.bf16.msra.mxu0 %v2080_v26  ;;  %1482 = vmatpush1.bf16.msra.mxu1 %v2082_v27 }
 0x90d   :  { %v1317_v2 = vpop.f32.mrb[28].mxu0  ;;  %v1358_v3 = vpop.f32.mrb[28].mxu1 }
 0x90e   :  { %v1319_v4 = vpop.f32.mrb[29].mxu0  ;;  %v1360_v5 = vpop.f32.mrb[29].mxu1 }
 0x90f   :  { %v1369_v6 = vcombine.low %v1317_v2, %v1319_v4  ;;  %v1370_v7 = vcombine.low %v1358_v3, %v1360_v5  ;;  %v1321_v8 = vpop.f32.mrb[30].mxu0  ;;  %v1362_v9 = vpop.f32.mrb[30].mxu1 }
 0x910   :  { %v1322_v10 = vpop.f32.mrb[31].mxu0  ;;  %v1363_v22 = vpop.f32.mrb[31].mxu1 }
 0x911   :  { %v1377_v23 = vrot.slane %v1369_v6, %v2125_v33  ;;  %v1384_v24 = vrot.slane %v1370_v7, %v2125_v33  ;;  %v1566_v10 = vld [vmem:[%s2372_s4] sm:$0x1] }
 0x913   :  { %v1385_v11 = vcombine.low %v1377_v23, %v1384_v24 }
 0x915   :  { %v1392_v26 = vrot.slane %v1385_v11, %v2125_v33  ;;  %v1572_v11 = vld [vmem:[#allocation5] sm:$0x1] }
 0x917   :  { %v1394_v59 = vadd.f32 %v1392_v26, %v1281_v25 }
 0x919   :  { %v1656_v27 = vmul.f32 -1.442695, %v1394_v59 }
 0x91b   :  { %1776 = vpow2.f32 %v1656_v27 }
 0x925   :  { %v1777_v12 = vpop.eup %1776 }
 0x926   :  { %v1398_v60 = vadd.f32 1.0, %v1777_v12 }
 0x928   :  { %1778 = vrcp.f32 %v1398_v60 }
 0x932   :  { %v1779_v13 = vpop.eup %1778 }
 0x933   :  { %v1402_v14 = vrot.slane %v1779_v13, 3  ;;  %v1406_v16 = vrot.slane %v1779_v13, 1  ;;  %v1420_v58 = vrot.slane %v1779_v13, 2 }
 0x935   :  { %v1404_v15 = vmul.f32 2.0, %v1402_v14  ;;  %v1408_v18 = vmul.f32 %v1406_v16, %v2335_v51 }
 0x937   :  { %v1657_v17 = vadd.f32 -1.0, %v1404_v15 }
 0x939   :  { %v1409_v19 = vmul.f32 %v1779_v13, %v1657_v17 }
 0x93b   :  { %v1410_v20 = vadd.f32 %v1409_v19, %v1408_v18 }
 0x93d   :  { %v1658_v21 = vmul.f32 -2.0, %v1410_v20 }
 0x93f   :  { %v1413_v41 = vmul.f32 1.442695, %v1658_v21 }
 0x941   :  { %1780 = vpow2.f32 %v1413_v41 }
 0x94b   :  { %v1781_v42 = vpop.eup %1780 }
 0x94c   :  { %v1415_v43 = vadd.f32 1.0, %v1781_v42 }
 0x94e   :  { %1782 = vrcp.f32 %v1415_v43 }
 0x958   :  { %v1783_v44 = vpop.eup %1782 }
 0x959   :  { %v1418_v46 = vmul.f32 2.0, %v1783_v44 }
 0x95b   :  { %v1659_v47 = vadd.f32 -1.0, %v1418_v46 }
 0x95d   :  { %v1422_v48 = vmul.f32 %v1659_v47, %v1420_v58 }
 0x95f   :  { %v1425_v49 = vpack.c.bf16 %v1422_v48, %v1422_v48 }
 0x961   :  { %1459 = vmatmul.mubr.bf16.vlgmr.msra.gmra.mrb[32].mxu0 %v1425_v49  ;;  %1500 = vmatmul.mubr.bf16.vlgmr.msra.gmra.mrb[32].mxu1 %v1425_v49 }
 0xa34   :  { %v1460_v37 = vpop.f32.mrb[32].mxu0  ;;  %v1501_v50 = vpop.f32.mrb[32].mxu1 }
 0xa35   :  { %v1462_v52 = vpop.f32.mrb[33].mxu0  ;;  %v1503_v51 = vpop.f32.mrb[33].mxu1 }
 0xa36   :  { %v1512_v53 = vcombine.low %v1460_v37, %v1462_v52  ;;  %v1513_v36 = vcombine.low %v1501_v50, %v1503_v51  ;;  %v1464_v54 = vpop.f32.mrb[34].mxu0  ;;  %v1505_v55 = vpop.f32.mrb[34].mxu1 }
 0xa37   :  { %v1465_v56 = vpop.f32.mrb[35].mxu0  ;;  %v1506_v57 = vpop.f32.mrb[35].mxu1 }
 0xa38   :  { %v1520_v28 = vrot.slane %v1512_v53, %v2125_v33  ;;  %v1527_v29 = vrot.slane %v1513_v36, %v2125_v33 }
 0xa3a   :  { %v1528_v30 = vcombine.low %v1520_v28, %v1527_v29 }
 0xa3c   :  { %v1535_v31 = vrot.slane %v1528_v30, %v2125_v33 }
 0xa3e   :  { %v1537_v32 = vadd.f32 %v1535_v31, %v1424_v45 }
 0xa40   :  { %v1660_v1 = vmul.f32 -1.442695, %v1537_v32 }
 0xa42   :  { %1784 = vpow2.f32 %v1660_v1 }
 0xa4c   :  { %v1785_v34 = vpop.eup %1784 }
 0xa4d   :  { %v1541_v35 = vadd.f32 1.0, %v1785_v34 }
 0xa4f   :  { %1786 = vrcp.f32 %v1541_v35 }
 0xa59   :  { %v1787_v38 = vpop.eup %1786 }
 0xa5a   :  { %v1545_v39 = vrot.slane %v1787_v38, 3  ;;  %v1549_v61 = vrot.slane %v1787_v38, 1  ;;  %v1563_v9 = vrot.slane %v1787_v38, 2 }
 0xa5c   :  { %v1547_v40 = vmul.f32 2.0, %v1545_v39  ;;  %v1551_v63 = vmul.f32 %v1549_v61, %v1410_v20 }
 0xa5e   :  { %v1661_v62 = vadd.f32 -1.0, %v1547_v40 }
 0xa60   :  { %v1552_v0 = vmul.f32 %v1787_v38, %v1661_v62 }
 0xa62   :  { %v1553_v2 = vadd.f32 %v1552_v0, %v1551_v63 }
 0xa64   :  { %v1662_v3 = vmul.f32 -2.0, %v1553_v2 }
 0xa66   :  { %v1556_v4 = vmul.f32 1.442695, %v1662_v3 }
 0xa68   :  { %1788 = vpow2.f32 %v1556_v4 }
 0xa72   :  { %v1789_v5 = vpop.eup %1788 }
 0xa73   :  { %v1558_v6 = vadd.f32 1.0, %v1789_v5 }
 0xa75   :  { %1790 = vrcp.f32 %v1558_v6 }
 0xa7f   :  { %v1791_v33 = vpop.eup %1790 }
 0xa80   :  { %v1561_v7 = vmul.f32 2.0, %v1791_v33 }
 0xa82   :  { %v1663_v8 = vadd.f32 -1.0, %v1561_v7 }
 0xa84   :  { %v1565_v22 = vmul.f32 %v1663_v8, %v1563_v9 }
 0xa86   :  { %v1567_v23 = vmul.f32 %v1566_v10, %v1565_v22 }
 0xa88   :  { %v1569_v24 = vsel %vm1568_vm0, %v1567_v23, 0.0 }
 0xa89   :  { %1570 = vadd.xlane.f32.xlu0 %v1569_v24 }
 0xb16   :  { %v1571_v25 = vpop.xlane.xlu0 %1570 }
 0xb17   :  { %v1573_v26 = vadd.f32 %v1572_v11, %v1571_v25 }
 0xb19   :  { %1575 = vst.msk [vmem:[#allocation11] sm:$0x1] %vm1574_vm1, %v1573_v26 }
 0xb1a   :  { %1871 = shalt.err (!%p1868_p6)
}
 0xb1b   :  { %s1872_s18 = scalar_lea.hbm %s2374_s6, 16 }
 0xb1c   :  { %p1873_p7 = scmp.ne.s32.totalorder %s2374_s6, %s1872_s18  ;;  %p1876_p8 = scmp.lt.u32.totalorder %s1872_s18, %s2374_s6 }
 0xb1e   :  { %p1878_p9 = pnand %p1876_p8, %p1873_p7 }
 0xb20   :  { %1881 = shalt.err (!%p1878_p9)
}
 0xb21   :  { %1585 = dma.vmem_to_hbm [thread:$0]  %s1583_s14, 16, %s2374_s6, [#allocation8]  }
 0xb22   :  { %1888 = dma.done.wait [#allocation8], 16  }
 0xb23   :  { %1889 = vsyncadd [#allocation8], 4294967280 }
 0xb24   :  { %1589 = vsyncpa [#allocation7], 1 }
 0xb25   :  { %1590 = vsyncpa [#allocation10], 1 }
 0xb26   :  { %1591 = vsyncpa [#allocation8], 1 }
 0xb27   :  { %1592 = vsyncmov [#allocation4] }
 0xb2a   :  { %s1593_s24 = vpop.sfrf %1592 }
 0xb2b   :  { %p1664_p10 = scmp.ne.s32.totalorder %s1593_s24, 0 }
 0xb2d   :  { %1597 = shalt.err (%p1664_p10)  }

</bundles_post_ra>
